<compile_context>
chip_gen: v6e
topology: v6e:2x2x1
jax: 0.10.0
libtpu: 0.0.40
codegen_flags: <defaults>
</compile_context>

<pallas_src>
import functools

import jax
import jax.numpy as jnp
from jax.experimental import pallas as pl
from jax.experimental.pallas import tpu as pltpu

LEAKY_SLOPE = 0.2


def _disc_kernel(x_ref, w1_ref, b1_ref, w2_ref, b2_ref, w3r_ref, b3_ref, o_ref):
    """Fused 3-layer discriminator forward for one (block_m, D) batch tile."""
    # Cast the activation tile to bf16 for the MXU (no-op if x is already
    # bf16); accumulate in f32.
    x = x_ref[...].astype(jnp.bfloat16)                               # (bm, D)

    # ---- layer 1: Linear + LeakyReLU(0.2) ---------------------------------
    h1 = jnp.dot(x, w1_ref[...], preferred_element_type=jnp.float32)  # (bm, H)
    h1 = h1 + b1_ref[...]                                             # + (1, H)
    h1 = jnp.where(h1 > 0, h1, LEAKY_SLOPE * h1)

    # ---- layer 2: Linear + LeakyReLU(0.2) ---------------------------------
    h2 = jnp.dot(h1.astype(jnp.bfloat16), w2_ref[...],
                 preferred_element_type=jnp.float32)                  # (bm, H)
    h2 = h2 + b2_ref[...]
    h2 = jnp.where(h2 > 0, h2, LEAKY_SLOPE * h2)

    # ---- layer 3: (H -> 1) as VPU multiply + lane reduce, then Sigmoid -----
    # Avoids a 1-output-column MXU matmul; reduction uses VPU/XLU slots.
    logits = jnp.sum(h2 * w3r_ref[...], axis=-1, keepdims=True)       # (bm, 1)
    # Relayout to a lane-dense row so the store is an unmasked, full-lane vst.
    logits_row = jnp.transpose(logits)                                # (1, bm)
    o_ref[...] = jax.nn.sigmoid(logits_row + b3_ref[0])               # SMEM scalar


def _choose_block_m(batch, cap=512):
    """Pick the batch tile size.

    Constraints: block_m must be a multiple of 128 (lane-dense (1, block_m)
    output block) or equal to the full batch (block == full array dims).
    Preferences: >=2 grid steps when possible (v7x megacore keeps both
    TensorCores busy), exact division of `batch` (zero tail waste), and the
    largest tile under `cap` (amortizes per-grid-step overhead on v6e without
    chasing oversized tiles that buy nothing on v5e).
    """
    if batch <= 128:
        return batch                      # single tile, block == full array
    cands = list(range(128, cap + 1, 128))
    multi = [m for m in cands if pl.cdiv(batch, m) >= 2]
    if multi:
        cands = multi
    exact = [m for m in cands if batch % m == 0]
    if exact:
        return max(exact)
    # Otherwise minimize wasted tail rows; tie-break toward the larger tile.
    return min(cands, key=lambda m: (pl.cdiv(batch, m) * m - batch, -m))


@functools.partial(jax.jit, static_argnames=("block_m",))
def discriminator_forward(x, params, *, block_m=None):
    """Fused discriminator forward via a single Pallas kernel.

    Args:
      x: (batch, input_dim) float32 or bfloat16 samples (bf16 is accepted
         as-is -- no wrapper cast pass over x).
      params: dict with w1 (D, H), b1 (1, H), w2 (H, H), b2 (1, H),
              w3 (H, 1), b3 (1, 1)  (float32).
      block_m: optional batch tile override; chosen automatically if None.

    Returns:
      (batch, 1) float32 probabilities.
    """
    B, D = x.shape
    H = params["w1"].shape[1]

    if block_m is None:
        block_m = _choose_block_m(B)
    nb = pl.cdiv(B, block_m)
    B_pad = nb * block_m          # output slab width only; x itself is NOT padded

    # Accept f32 / bf16 input as-is.  Do NOT insert a standalone cast pass
    # over x (that would re-read + re-write x in HBM and is net negative).
    if x.dtype not in (jnp.float32, jnp.bfloat16):
        x = x.astype(jnp.float32)

    # bf16 weights for the MXU; f32 biases; w3 as a (1, H) lane row for the
    # in-kernel VPU reduction; b3 as a single SMEM scalar.
    w1 = params["w1"].astype(jnp.bfloat16)
    w2 = params["w2"].astype(jnp.bfloat16)
    b1 = params["b1"].reshape(1, H).astype(jnp.float32)
    b2 = params["b2"].reshape(1, H).astype(jnp.float32)
    w3r = params["w3"].reshape(1, H).astype(jnp.float32)
    b3 = params["b3"].reshape(1).astype(jnp.float32)

    in_specs = [
        pl.BlockSpec((block_m, D), lambda i: (i, 0)),          # x tile (per step)
        pl.BlockSpec((D, H), lambda i: (0, 0),                 # w1, grid-invariant,
                     pipeline_mode=pl.Buffered(1)),            #   single-buffered
        pl.BlockSpec((1, H), lambda i: (0, 0)),                # b1
        pl.BlockSpec((H, H), lambda i: (0, 0),                 # w2, grid-invariant,
                     pipeline_mode=pl.Buffered(1)),            #   single-buffered
        pl.BlockSpec((1, H), lambda i: (0, 0)),                # b2
        pl.BlockSpec((1, H), lambda i: (0, 0)),                # w3 row
        pl.BlockSpec(memory_space=pltpu.MemorySpace.SMEM),     # b3 scalar
    ]
    # Lane-dense output slab: (1, B_pad) written in full (1, block_m) rows.
    out_specs = pl.BlockSpec((1, block_m), lambda i: (0, i))

    flops = 2 * B_pad * (D * H + H * H + H)
    bytes_accessed = (B * D * x.dtype.itemsize + w1.size * 2 + w2.size * 2
                      + (3 * H + 1) * 4 + B_pad * 4)
    cost = pl.CostEstimate(flops=flops, transcendentals=2 * B_pad,
                           bytes_accessed=bytes_accessed)

    # Explicit VMEM limit only when the footprint might exceed the smallest
    # default scoped limit (v5e: 16 MiB); at H=256 this stays on defaults.
    vmem_est = (2 * block_m * D * x.dtype.itemsize     # x tile, double-buffered
                + D * H * 2 + H * H * 2                # bf16 weights, single-buffered
                + 4 * 3 * H * 4                        # small (1,H) rows
                + 2 * block_m * 4                      # output row tile
                + 8 * block_m * H)                     # f32 h1/h2 working-set headroom
    vmem_limit = None
    if vmem_est > 12 * (1 << 20):
        vmem_limit = int(min(2 * vmem_est, 64 * (1 << 20)))   # v7x physical = 64 MiB

    out_row = pl.pallas_call(
        _disc_kernel,
        out_shape=jax.ShapeDtypeStruct((1, B_pad), jnp.float32),
        grid_spec=pltpu.PrefetchScalarGridSpec(
            num_scalar_prefetch=0,
            grid=(nb,),
            in_specs=in_specs,
            out_specs=out_specs,
        ),
        compiler_params=pltpu.CompilerParams(
            dimension_semantics=("parallel",),   # batch tiles -> megacore on v7x
            vmem_limit_bytes=vmem_limit,
        ),
        cost_estimate=cost,
    )(x, w1, b1, w2, b2, w3r, b3)

    # Drop the (masked-in-kernel) tail columns and present as (B, 1).
    return out_row[0, :B][:, None]


def init_discriminator_params(key, input_dim=784, hidden_dim=256):
    """Deterministic synthetic parameter init (normal * 0.02, zero bias)."""
    k1, k2, k3 = jax.random.split(key, 3)
    scale = 0.02
    return {
        "w1": scale * jax.random.normal(k1, (input_dim, hidden_dim), jnp.float32),
        "b1": jnp.zeros((1, hidden_dim), jnp.float32),
        "w2": scale * jax.random.normal(k2, (hidden_dim, hidden_dim), jnp.float32),
        "b2": jnp.zeros((1, hidden_dim), jnp.float32),
        "w3": scale * jax.random.normal(k3, (hidden_dim, 1), jnp.float32),
        "b3": jnp.zeros((1, 1), jnp.float32),
    }


def _reference_forward(x, p):
    """Plain-JAX f32 reference for correctness check."""
    h1 = x @ p["w1"] + p["b1"]
    h1 = jnp.where(h1 > 0, h1, LEAKY_SLOPE * h1)
    h2 = h1 @ p["w2"] + p["b2"]
    h2 = jnp.where(h2 > 0, h2, LEAKY_SLOPE * h2)
    return jax.nn.sigmoid(h2 @ p["w3"] + p["b3"])


if __name__ == "__main__":
    key = jax.random.PRNGKey(0)
    k_param, k_x = jax.random.split(key)

    # Module defaults (input_dim=784, hidden_dim=256).
    batch, input_dim, hidden_dim = 384, 784, 256
    params = init_discriminator_params(k_param, input_dim, hidden_dim)
    x = jax.random.normal(k_x, (batch, input_dim), jnp.float32)

    # 1) main path: auto block_m (128 -> grid of 3, zero padding, >=2 steps).
    out = jax.block_until_ready(discriminator_forward(x, params))
    ref = _reference_forward(x, params)
    assert out.shape == (batch, 1), out.shape
    # bf16 MXU operands vs f32 reference -> loosened tolerance.
    assert jnp.allclose(out, ref, atol=2e-2, rtol=2e-2), (
        "mismatch vs reference, max abs err = "
        f"{float(jnp.max(jnp.abs(out - ref)))}")

    # 2) ragged tail: batch not a multiple of the tile -> partial last block
    #    handled in-kernel (no host-side pad), padded columns sliced off.
    x_tail = x[:200]
    out_t = jax.block_until_ready(discriminator_forward(x_tail, params))
    ref_t = _reference_forward(x_tail, params)
    assert out_t.shape == (200, 1), out_t.shape
    assert jnp.allclose(out_t, ref_t, atol=2e-2, rtol=2e-2), (
        f"tail mismatch, max abs err = {float(jnp.max(jnp.abs(out_t - ref_t)))}")

    # 3) bf16 input passthrough (no wrapper cast, half the x HBM bytes).
    x_bf16 = x.astype(jnp.bfloat16)
    out_b = jax.block_until_ready(discriminator_forward(x_bf16, params))
    ref_b = _reference_forward(x_bf16.astype(jnp.float32), params)
    assert jnp.allclose(out_b, ref_b, atol=3e-2, rtol=3e-2), (
        f"bf16 mismatch, max abs err = {float(jnp.max(jnp.abs(out_b - ref_b)))}")

    print("KERNEL_OK")
</pallas_src>

<mosaic_0001>
module attributes {stable_mosaic.version = 11 : i64} {
  func.func @_disc_kernel(%arg0: i32, %arg1: memref<128x784xf32, #tpu.memory_space<vmem>>, %arg2: memref<784x256xbf16, #tpu.memory_space<vmem>>, %arg3: memref<1x256xf32, #tpu.memory_space<vmem>>, %arg4: memref<256x256xbf16, #tpu.memory_space<vmem>>, %arg5: memref<1x256xf32, #tpu.memory_space<vmem>>, %arg6: memref<1x256xf32, #tpu.memory_space<vmem>>, %arg7: memref<1xf32, #tpu.memory_space<smem>>, %arg8: memref<1x128xf32, #tpu.memory_space<vmem>>) attributes {dimension_semantics = [#tpu.dimension_semantics<parallel>], iteration_bounds = array<i64: 3>, scalar_prefetch = 0 : i64, scratch_operands = 0 : i64, tpu.core_type = #tpu.core_type<tc>, window_params = [{transform_indices = @transform_0, window_bounds = array<i64: 128, 784>}, {pipeline_mode = #tpu.pipeline_mode<synchronous>, transform_indices = @transform_1, window_bounds = array<i64: 784, 256>}, {pipeline_mode = #tpu.pipeline_mode<synchronous>, transform_indices = @transform_2, window_bounds = array<i64: 1, 256>}, {pipeline_mode = #tpu.pipeline_mode<synchronous>, transform_indices = @transform_3, window_bounds = array<i64: 256, 256>}, {pipeline_mode = #tpu.pipeline_mode<synchronous>, transform_indices = @transform_4, window_bounds = array<i64: 1, 256>}, {pipeline_mode = #tpu.pipeline_mode<synchronous>, transform_indices = @transform_5, window_bounds = array<i64: 1, 256>}, {transform_indices = @transform_6, window_bounds = array<i64: 1>}, {transform_indices = @transform_7, window_bounds = array<i64: 1, 128>}]} {
    %c0 = arith.constant 0 : index
    %c0_0 = arith.constant 0 : index
    %0 = vector.load %arg1[%c0, %c0_0] : memref<128x784xf32, #tpu.memory_space<vmem>>, vector<128x784xf32>
    %1 = arith.truncf %0 : vector<128x784xf32> to vector<128x784xbf16>
    %c0_1 = arith.constant 0 : index
    %c0_2 = arith.constant 0 : index
    %2 = vector.load %arg2[%c0_1, %c0_2] : memref<784x256xbf16, #tpu.memory_space<vmem>>, vector<784x256xbf16>
    %cst = arith.constant dense<0.000000e+00> : vector<128x256xf32>
    %3 = tpu.matmul %1, %2, %cst {dimension_numbers = #tpu.dot_dimension_numbers<[1], [0], [0], [1], [0, 0, 1, 1], [], []>} : vector<128x784xbf16>, vector<784x256xbf16>, vector<128x256xf32> -> vector<128x256xf32>
    %c0_3 = arith.constant 0 : index
    %c0_4 = arith.constant 0 : index
    %4 = vector.load %arg3[%c0_3, %c0_4] : memref<1x256xf32, #tpu.memory_space<vmem>>, vector<1x256xf32>
    %5 = vector.broadcast %4 : vector<1x256xf32> to vector<128x256xf32>
    %6 = arith.addf %3, %5 : vector<128x256xf32>
    %cst_5 = arith.constant 0.000000e+00 : f32
    %7 = vector.broadcast %cst_5 : f32 to vector<128x256xf32>
    %8 = arith.cmpf ogt, %6, %7 : vector<128x256xf32>
    %cst_6 = arith.constant 2.000000e-01 : f32
    %9 = vector.broadcast %cst_6 : f32 to vector<128x256xf32>
    %10 = arith.mulf %9, %6 : vector<128x256xf32>
    %11 = arith.select %8, %6, %10 : vector<128x256xi1>, vector<128x256xf32>
    %12 = arith.truncf %11 : vector<128x256xf32> to vector<128x256xbf16>
    %c0_7 = arith.constant 0 : index
    %c0_8 = arith.constant 0 : index
    %13 = vector.load %arg4[%c0_7, %c0_8] : memref<256x256xbf16, #tpu.memory_space<vmem>>, vector<256x256xbf16>
    %cst_9 = arith.constant dense<0.000000e+00> : vector<128x256xf32>
    %14 = tpu.matmul %12, %13, %cst_9 {dimension_numbers = #tpu.dot_dimension_numbers<[1], [0], [0], [1], [0, 0, 1, 1], [], []>} : vector<128x256xbf16>, vector<256x256xbf16>, vector<128x256xf32> -> vector<128x256xf32>
    %c0_10 = arith.constant 0 : index
    %c0_11 = arith.constant 0 : index
    %15 = vector.load %arg5[%c0_10, %c0_11] : memref<1x256xf32, #tpu.memory_space<vmem>>, vector<1x256xf32>
    %16 = vector.broadcast %15 : vector<1x256xf32> to vector<128x256xf32>
    %17 = arith.addf %14, %16 : vector<128x256xf32>
    %cst_12 = arith.constant 0.000000e+00 : f32
    %18 = vector.broadcast %cst_12 : f32 to vector<128x256xf32>
    %19 = arith.cmpf ogt, %17, %18 : vector<128x256xf32>
    %cst_13 = arith.constant 2.000000e-01 : f32
    %20 = vector.broadcast %cst_13 : f32 to vector<128x256xf32>
    %21 = arith.mulf %20, %17 : vector<128x256xf32>
    %22 = arith.select %19, %17, %21 : vector<128x256xi1>, vector<128x256xf32>
    %c0_14 = arith.constant 0 : index
    %c0_15 = arith.constant 0 : index
    %23 = vector.load %arg6[%c0_14, %c0_15] : memref<1x256xf32, #tpu.memory_space<vmem>>, vector<1x256xf32>
    %24 = vector.broadcast %23 : vector<1x256xf32> to vector<128x256xf32>
    %25 = arith.mulf %22, %24 : vector<128x256xf32>
    %cst_16 = arith.constant dense<0.000000e+00> : vector<128xf32>
    %26 = vector.multi_reduction <add>, %25, %cst_16 [1] : vector<128x256xf32> to vector<128xf32>
    %27 = vector.shape_cast %26 : vector<128xf32> to vector<128x1xf32>
    %28 = tpu.transpose %27, [1, 0] : vector<128x1xf32> -> vector<1x128xf32>
    %c0_17 = arith.constant 0 : index
    %29 = memref.load %arg7[%c0_17] : memref<1xf32, #tpu.memory_space<smem>>
    %30 = vector.broadcast %29 : f32 to vector<1x128xf32>
    %31 = arith.addf %28, %30 : vector<1x128xf32>
    %32 = arith.negf %31 : vector<1x128xf32>
    %33 = math.exp %32 : vector<1x128xf32>
    %cst_18 = arith.constant 1.000000e+00 : f32
    %34 = vector.broadcast %cst_18 : f32 to vector<1x128xf32>
    %35 = arith.addf %34, %33 : vector<1x128xf32>
    %36 = arith.divf %34, %35 : vector<1x128xf32>
    %c0_19 = arith.constant 0 : index
    %c0_20 = arith.constant 0 : index
    %37 = vector.load %arg8[%c0_19, %c0_20] : memref<1x128xf32, #tpu.memory_space<vmem>>, vector<1x128xf32>
    tpu.vector_store %arg8[%c0_19, %c0_20], %36 {strides = array<i32>} : memref<1x128xf32, #tpu.memory_space<vmem>>, vector<1x128xf32>,
    return
  }
  func.func @transform_0(%arg0: i32) -> (i32, i32) {
    %c0_i32 = arith.constant 0 : i32
    %c0_i32_0 = arith.constant 0 : i32
    return %arg0, %c0_i32 : i32, i32
  }
  func.func @transform_1(%arg0: i32) -> (i32, i32) {
    %c0_i32 = arith.constant 0 : i32
    %c0_i32_0 = arith.constant 0 : i32
    %c0_i32_1 = arith.constant 0 : i32
    return %c0_i32, %c0_i32_0 : i32, i32
  }
  func.func @transform_2(%arg0: i32) -> (i32, i32) {
    %c0_i32 = arith.constant 0 : i32
    %c0_i32_0 = arith.constant 0 : i32
    %c0_i32_1 = arith.constant 0 : i32
    return %c0_i32, %c0_i32_0 : i32, i32
  }
  func.func @transform_3(%arg0: i32) -> (i32, i32) {
    %c0_i32 = arith.constant 0 : i32
    %c0_i32_0 = arith.constant 0 : i32
    %c0_i32_1 = arith.constant 0 : i32
    return %c0_i32, %c0_i32_0 : i32, i32
  }
  func.func @transform_4(%arg0: i32) -> (i32, i32) {
    %c0_i32 = arith.constant 0 : i32
    %c0_i32_0 = arith.constant 0 : i32
    %c0_i32_1 = arith.constant 0 : i32
    return %c0_i32, %c0_i32_0 : i32, i32
  }
  func.func @transform_5(%arg0: i32) -> (i32, i32) {
    %c0_i32 = arith.constant 0 : i32
    %c0_i32_0 = arith.constant 0 : i32
    %c0_i32_1 = arith.constant 0 : i32
    return %c0_i32, %c0_i32_0 : i32, i32
  }
  func.func @transform_6(%arg0: i32) -> i32 {
    %c0_i32 = arith.constant 0 : i32
    %c0_i32_0 = arith.constant 0 : i32
    return %c0_i32 : i32
  }
  func.func @transform_7(%arg0: i32) -> (i32, i32) {
    %c0_i32 = arith.constant 0 : i32
    %c0_i32_0 = arith.constant 0 : i32
    return %c0_i32, %arg0 : i32, i32
  }
}

</mosaic_0001>

<bundles_post_ra>
// kernel: discriminator_forward.1
= control target key start
LH: loop header
LB: loop body
LE: loop exit
PB: predicated region body
PF: predicated region fallthrough
CT: control target
= control target key end

     0   :  { %s3656_s0 = inlined_call_operand.vmem [shape: f32[384,784], index: 0, kind: input, shape index: {}]   ;;  %s3657_s1 = inlined_call_operand.vmem [shape: bf16[784,256], index: 1, kind: input, shape index: {}]   ;;  %s3658_s2 = inlined_call_operand.vmem [shape: f32[1,256], index: 2, kind: input, shape index: {}]   ;;  %s3659_s3 = inlined_call_operand.vmem [shape: bf16[256,256], index: 3, kind: input, shape index: {}]   ;;  %s3660_s4 = inlined_call_operand.vmem [shape: f32[1,256], index: 4, kind: input, shape index: {}]   ;;  %s3661_s5 = inlined_call_operand.vmem [shape: f32[1,256], index: 5, kind: input, shape index: {}]   ;;  %s3662_s6 = inlined_call_operand.<no memory space> [shape: f32[1], index: 6, kind: input, shape index: {}]   ;;  %s3663_s7 = inlined_call_operand.hbm [shape: f32[1,384], index: 7, kind: output, shape index: {}]  }
   0x1   :  { %12 = sst [smem:[#allocation2]] %s3662_s6 }
   0x2   :  { %13 = vsyncpa [#allocation4], 0 }
   0x3   :  { %15 = vsyncpa [#allocation4 + $0x1], 0  ;;  %s2782_s26 = smov 0   ;;  %s2784_s27 = smov 0  }
   0x4   :  { %s2786_s28 = smov 0   ;;  %s2788_s29 = smov 0  }
   0x5 LB: > { %s2254_s6 = sadd.s32 4294967295, %s2735_s29   ;;  %s2255_s30 = sadd.s32 4294967294, %s2735_s29   ;;  %s2735_s29 = sphi %s2788_s29, %s3669_s29   ;;  %s2731_s28 = sphi %s2786_s28, %s3668_s28   ;;  %s2727_s27 = sphi %s2784_s27, %s3667_s27   ;;  %s2723_s26 = sphi %s2782_s26, %s3666_s26  }
   0x6   : > { %s2805_s8 = sadd.s32 1, %s2735_s29   ;;  %s180_s9 = sadd.s32 1, %s2731_s28 }
   0x7   : > { %s177_s10 = ssub.s32 %s2735_s29, %s2805_s8  ;;  %p190_p0 = scmp.ne.s32.totalorder %s2731_s28, %s2727_s27 }
   0x8   : > { %p178_p1 = scmp.eq.s32.totalorder %s177_s10, 0  ;;  %p191_p2 = scmp.eq.s32.totalorder %s2254_s6, 2 }
   0x9   : > { %p196_p3 = scmp.ne.s32.totalorder %s2727_s27, %s2723_s26  ;;  %p197_p4 = scmp.eq.s32.totalorder %s2255_s30, 2 }
   0xa   : > { %s2817_s11 = scalar_select %p178_p1, %s2731_s28, %s180_s9  }
   0xb   : > { %p2819_p5 = por %p191_p2, %p190_p0  ;;  %p2823_p6 = por %p197_p4, %p196_p3 }
   0xc   : > { %p2258_p7 = scmp.ge.s32.totalorder %s2735_s29, 1  ;;  %p243_p8 = scmp.lt.s32.totalorder %s2735_s29, 4 }
   0xe   : > { %p244_p9 = pnand %p2258_p7, %p243_p8 }
   0xf   : > { %s2918_s9 = sshll.u32 (!%p244_p9), %s2254_s6, 4  ;;  %s2177_s25 = sld [smem:[#allocation2]] (!%p244_p9) }
  0x10   : > { %247 = sbr.rel (%p244_p9) target bundleno = 873 (0x369), region = 48  ;;  %p276_p10 = scmp.lt.s32.totalorder (!%p244_p9), %s2918_s9, 47 }
  0x11   : > { %s273_s10 = sand.u32 (!%p244_p9), 1, %s2727_s27   ;;  %s3621_s16 = scalar_lea.hbm (!%p244_p9), %s3663_s7, %s2918_s9 }
  0x12   : > { %s2188_s18 = scalar_lea.sflag (!%p244_p9), [#allocation4], %s273_s10  ;;  %s2738_s20 = smov (!%p244_p9), [#allocation3]  }
  0x13   : > { %s2679_s21 = sshll.u32 (!%p244_p9), %s2738_s20, 4  ;;  %s2680_s21 = int_to_ptr.vmem [resolvable:$false] %s2679_s21 }
  0x15   : > { %v2476_v0 = vld [vmem:[%s3657_s1 + $0x74] ss:$8 sps:$4 sm:$0xff]   ;;  %v2480_v2 = vld [vmem:[%s3657_s1 + $0x70] ss:$8 sps:$4 sm:$0xff]   ;;  %v2482_v4 = vld [vmem:[%s3657_s1 + $0x64] ss:$8 sps:$4 sm:$0xff]  }
  0x16   : > { %v2478_v1 = vld [vmem:[%s3657_s1 + $0x174] ss:$8 sps:$4 sm:$0xff]   ;;  %1076 = vmatprep.subr.bf16.mxu0 %v2476_v0  ;;  %v2481_v3 = vld [vmem:[%s3657_s1 + $0x170] ss:$8 sps:$4 sm:$0xff]   ;;  %v2484_v5 = vld [vmem:[%s3657_s1 + $0x164] ss:$8 sps:$4 sm:$0xff]  }
  0x17   : > { %1189 = vmatprep.subr.bf16.mxu1 %v2478_v1  ;;  %1077 = vmatpush1.bf16.msra.mxu0 %v2480_v2  ;;  %v2486_v6 = vld [vmem:[%s3657_s1 + $0x60] ss:$8 sps:$4 sm:$0xff]   ;;  %v2488_v8 = vld [vmem:[%s3657_s1 + $0x54] ss:$8 sps:$4 sm:$0xff]   ;;  %v2492_v10 = vld [vmem:[%s3657_s1 + $0x50] ss:$8 sps:$4 sm:$0xff]  }
  0x18   : > { %1190 = vmatpush1.bf16.msra.mxu1 %v2481_v3  ;;  %1078 = vmatprep.subr.bf16.mxu0 %v2482_v4  ;;  %v2487_v7 = vld [vmem:[%s3657_s1 + $0x160] ss:$8 sps:$4 sm:$0xff]   ;;  %v2490_v9 = vld [vmem:[%s3657_s1 + $0x154] ss:$8 sps:$4 sm:$0xff]   ;;  %v2493_v11 = vld [vmem:[%s3657_s1 + $0x150] ss:$8 sps:$4 sm:$0xff]  }
  0x19   : > { %1191 = vmatprep.subr.bf16.mxu1 %v2484_v5  ;;  %v2494_v12 = vld [vmem:[%s3657_s1 + $0x44] ss:$8 sps:$4 sm:$0xff]   ;;  %v2498_v14 = vld [vmem:[%s3657_s1 + $0x40] ss:$8 sps:$4 sm:$0xff]   ;;  %v2500_v16 = vld [vmem:[%s3657_s1 + $0x34] ss:$8 sps:$4 sm:$0xff]  }
  0x1a   : > { %v2496_v13 = vld [vmem:[%s3657_s1 + $0x144] ss:$8 sps:$4 sm:$0xff]   ;;  %v2499_v15 = vld [vmem:[%s3657_s1 + $0x140] ss:$8 sps:$4 sm:$0xff]   ;;  %v2502_v17 = vld [vmem:[%s3657_s1 + $0x134] ss:$8 sps:$4 sm:$0xff]  }
  0x1b   : > { %1079 = vmatpush1.bf16.msra.mxu0 %v2486_v6  ;;  %v2504_v18 = vld [vmem:[%s3657_s1 + $0x30] ss:$8 sps:$4 sm:$0xff]   ;;  %v2506_v20 = vld [vmem:[%s3657_s1 + $0x24] ss:$8 sps:$4 sm:$0xff]   ;;  %v2510_v22 = vld [vmem:[%s3657_s1 + $0x20] ss:$8 sps:$4 sm:$0xff]  }
  0x1c   : > { %1192 = vmatpush1.bf16.msra.mxu1 %v2487_v7  ;;  %1080 = vmatprep.subr.bf16.mxu0 %v2488_v8  ;;  %v2505_v19 = vld [vmem:[%s3657_s1 + $0x130] ss:$8 sps:$4 sm:$0xff]   ;;  %v2508_v21 = vld [vmem:[%s3657_s1 + $0x124] ss:$8 sps:$4 sm:$0xff]   ;;  %v2511_v23 = vld [vmem:[%s3657_s1 + $0x120] ss:$8 sps:$4 sm:$0xff]  }
  0x1d   : > { %1193 = vmatprep.subr.bf16.mxu1 %v2490_v9  ;;  %v2512_v24 = vld [vmem:[%s3657_s1 + $0x14] ss:$8 sps:$4 sm:$0xff]   ;;  %v2516_v26 = vld [vmem:[%s3657_s1 + $0x10] ss:$8 sps:$4 sm:$0xff]   ;;  %v2518_v28 = vld [vmem:[%s3657_s1 + $0x4] ss:$8 sps:$4 sm:$0xff]  }
  0x1e   : > { %v2514_v25 = vld [vmem:[%s3657_s1 + $0x114] ss:$8 sps:$4 sm:$0xff]   ;;  %v2517_v27 = vld [vmem:[%s3657_s1 + $0x110] ss:$8 sps:$4 sm:$0xff]   ;;  %v2520_v29 = vld [vmem:[%s3657_s1 + $0x104] ss:$8 sps:$4 sm:$0xff]  }
  0x1f   : > { %1081 = vmatpush1.bf16.msra.mxu0 %v2492_v10  ;;  %v2522_v30 = vld [vmem:[%s3657_s1] ss:$8 sps:$4 sm:$0xff]   ;;  %v2524_v32 = vld [vmem:[%s3657_s1 + $0xf4] ss:$8 sps:$4 sm:$0xff]   ;;  %v2528_v34 = vld [vmem:[%s3657_s1 + $0xf0] ss:$8 sps:$4 sm:$0xff]  }
  0x20   : > { %1194 = vmatpush1.bf16.msra.mxu1 %v2493_v11  ;;  %1082 = vmatprep.subr.bf16.mxu0 %v2494_v12  ;;  %v2523_v31 = vld [vmem:[%s3657_s1 + $0x100] ss:$8 sps:$4 sm:$0xff]   ;;  %v2526_v33 = vld [vmem:[%s3657_s1 + $0x1f4] ss:$8 sps:$4 sm:$0xff]   ;;  %v2529_v35 = vld [vmem:[%s3657_s1 + $0x1f0] ss:$8 sps:$4 sm:$0xff]  }
  0x21   : > { %1195 = vmatprep.subr.bf16.mxu1 %v2496_v13  ;;  %s277_s30 = scalar_select %p276_p10, %s2918_s9, 47  ;;  %v2530_v36 = vld [vmem:[%s3657_s1 + $0xe4] ss:$8 sps:$4 sm:$0xff]   ;;  %v2534_v38 = vld [vmem:[%s3657_s1 + $0xe0] ss:$8 sps:$4 sm:$0xff]   ;;  %vm1051_vm0 = vcmask 130048  }
  0x22   : > { %v2532_v37 = vld [vmem:[%s3657_s1 + $0x1e4] ss:$8 sps:$4 sm:$0xff]   ;;  %v2535_v39 = vld [vmem:[%s3657_s1 + $0x1e0] ss:$8 sps:$4 sm:$0xff]   ;;  %v2536_v40 = vld [vmem:[%s3657_s1 + $0xd4] ss:$8 sps:$4 sm:$0xff]  }
  0x23   : > { %1083 = vmatpush1.bf16.msra.mxu0 %v2498_v14  ;;  %s2435_s6 = smul.u32 56, %s277_s30  ;;  %v2538_v41 = vld [vmem:[%s3657_s1 + $0x1d4] ss:$8 sps:$4 sm:$0xff]   ;;  %v2540_v42 = vld [vmem:[%s3657_s1 + $0xd0] ss:$8 sps:$4 sm:$0xff]  }
  0x24   : > { %1196 = vmatpush1.bf16.msra.mxu1 %v2499_v15  ;;  %1084 = vmatprep.subr.bf16.mxu0 %v2500_v16  ;;  %v2541_v43 = vld [vmem:[%s3657_s1 + $0x1d0] ss:$8 sps:$4 sm:$0xff]   ;;  %v2542_v44 = vld [vmem:[%s3657_s1 + $0xc4] ss:$8 sps:$4 sm:$0xff]   ;;  %v2546_v50 = vld [vmem:[%s3657_s1 + $0xc0] ss:$8 sps:$4 sm:$0xff]  }
  0x25   : > { %1197 = vmatprep.subr.bf16.mxu1 %v2502_v17  ;;  %s2970_s17 = scalar_lea.vmem %s3656_s0, %s2435_s6  ;;  %v2544_v45 = vld [vmem:[%s3657_s1 + $0x1c4] ss:$8 sps:$4 sm:$0xff]   ;;  %v2547_v51 = vld [vmem:[%s3657_s1 + $0x1c0] ss:$8 sps:$4 sm:$0xff]   ;;  %v2548_v52 = vld [vmem:[%s3657_s1 + $0xb4] ss:$8 sps:$4 sm:$0xff]  }
  0x26   : > { %v284_v46 = vld [vmem:[%s2970_s17 + $0x8] sm:$0xff]  ;;  %v291_v47 = vld [vmem:[%s2970_s17 + $0x40] sm:$0xff]  ;;  %v286_v48 = vld [vmem:[%s2970_s17 + $0x18] sm:$0xff]  ;;  %s2681_s6 = scalar_lea.vmem %s2680_s21, 32 }
  0x27   : > { %1085 = vmatpush1.bf16.msra.mxu0 %v2504_v18  ;;  %v293_v49 = vld [vmem:[%s2970_s17 + $0x50] sm:$0xff]  ;;  %v396_v53 = vpack.c.bf16 %v291_v47, %v284_v46  ;;  %v2554_v58 = vld [vmem:[%s3657_s1 + $0xa4] ss:$8 sps:$4 sm:$0xff]   ;;  %v2558_v60 = vld [vmem:[%s3657_s1 + $0xa0] ss:$8 sps:$4 sm:$0xff]  }
  0x28   : > { %1198 = vmatpush1.bf16.msra.mxu1 %v2505_v19  ;;  %1086 = vmatprep.subr.bf16.mxu0 %v2506_v20  ;;  %v398_v54 = vpack.c.bf16 %v293_v49, %v286_v48  ;;  %v2550_v55 = vld [vmem:[%s3657_s1 + $0x1b4] ss:$8 sps:$4 sm:$0xff]   ;;  %v2552_v56 = vld [vmem:[%s3657_s1 + $0xb0] ss:$8 sps:$4 sm:$0xff]   ;;  %v2556_v59 = vld [vmem:[%s3657_s1 + $0x1a4] ss:$8 sps:$4 sm:$0xff]  }
  0x29   : > { %1199 = vmatprep.subr.bf16.mxu1 %v2508_v21  ;;  %1108 = vmatprep.mubr.bf16.mxu0 %v396_v53  ;;  %v2553_v57 = vld [vmem:[%s3657_s1 + $0x1b0] ss:$8 sps:$4 sm:$0xff]   ;;  %v2559_v61 = vld [vmem:[%s3657_s1 + $0x1a0] ss:$8 sps:$4 sm:$0xff]   ;;  %v2560_v62 = vld [vmem:[%s3657_s1 + $0x94] ss:$8 sps:$4 sm:$0xff]  }
  0x2a   : > { %1221 = vmatprep.mubr.bf16.mxu1 %v398_v54  ;;  %v2562_v63 = vld [vmem:[%s3657_s1 + $0x194] ss:$8 sps:$4 sm:$0xff]   ;;  %v2564_v0 = vld [vmem:[%s3657_s1 + $0x90] ss:$8 sps:$4 sm:$0xff]   ;;  %v2566_v2 = vld [vmem:[%s3657_s1 + $0x84] ss:$8 sps:$4 sm:$0xff]  }
  0x2b   : > { %1087 = vmatpush1.bf16.msra.mxu0 %v2510_v22  ;;  %v2565_v1 = vld [vmem:[%s3657_s1 + $0x190] ss:$8 sps:$4 sm:$0xff]   ;;  %v2568_v3 = vld [vmem:[%s3657_s1 + $0x184] ss:$8 sps:$4 sm:$0xff]   ;;  %v2570_v4 = vld [vmem:[%s3657_s1 + $0x80] ss:$8 sps:$4 sm:$0xff]  }
  0x2c   : > { %1200 = vmatpush1.bf16.msra.mxu1 %v2511_v23  ;;  %1088 = vmatprep.subr.bf16.mxu0 %v2512_v24  ;;  %v2571_v5 = vld [vmem:[%s3657_s1 + $0x180] ss:$8 sps:$4 sm:$0xff]   ;;  %v290_v7 = vld [vmem:[%s2970_s17 + $0x38] sm:$0xff]  ;;  %v285_v8 = vld [vmem:[%s2970_s17 + $0x10] sm:$0xff] }
  0x2d   : > { %1201 = vmatprep.subr.bf16.mxu1 %v2514_v25  ;;  %v283_v6 = vld [vmem:[%s2970_s17] sm:$0xff]  ;;  %v292_v9 = vld [vmem:[%s2970_s17 + $0x48] sm:$0xff]  ;;  %v2574_v10 = vld [vmem:[%s3657_s1 + $0x274] ss:$8 sps:$4 sm:$0xff]  }
  0x2e   : > { %v2577_v11 = vld [vmem:[%s3657_s1 + $0x304] ss:$8 sps:$4 sm:$0xff]   ;;  %v2572_v12 = vld [vmem:[%s3657_s1 + $0x270] ss:$8 sps:$4 sm:$0xff]   ;;  %v395_v15 = vpack.c.bf16 %v290_v7, %v283_v6  ;;  %v397_v16 = vpack.c.bf16 %v292_v9, %v285_v8  ;;  %v2575_v19 = vld [vmem:[%s3657_s1 + $0x300] ss:$8 sps:$4 sm:$0xff]  }
  0x2f   : > { %1089 = vmatpush1.bf16.msra.mxu0 %v2516_v26  ;;  %v298_v13 = vld [vmem:[%s2970_s17 + $0x78] sm:$0xff]  ;;  %v305_v14 = vld [vmem:[%s2970_s17 + $0xb0] sm:$0xff]  ;;  %v300_v17 = vld [vmem:[%s2970_s17 + $0x88] sm:$0xff] }
  0x30   : > { %1202 = vmatpush1.bf16.msra.mxu1 %v2517_v27  ;;  %1090 = vmatprep.subr.bf16.mxu0 %v2518_v28  ;;  %v307_v18 = vld [vmem:[%s2970_s17 + $0xc0] sm:$0xff]  ;;  %v403_v21 = vpack.c.bf16 %v305_v14, %v298_v13  ;;  %v297_v24 = vld [vmem:[%s2970_s17 + $0x70] sm:$0xff]  ;;  %v304_v25 = vld [vmem:[%s2970_s17 + $0xa8] sm:$0xff] }
  0x31   : > { %1203 = vmatprep.subr.bf16.mxu1 %v2520_v29  ;;  %v2580_v20 = vld [vmem:[%s3657_s1 + $0x264] ss:$8 sps:$4 sm:$0xff]   ;;  %v2578_v22 = vld [vmem:[%s3657_s1 + $0x260] ss:$8 sps:$4 sm:$0xff]   ;;  %v405_v23 = vpack.c.bf16 %v307_v18, %v300_v17  ;;  %v306_v27 = vld [vmem:[%s2970_s17 + $0xb8] sm:$0xff] }
  0x32   : > { %v299_v26 = vld [vmem:[%s2970_s17 + $0x80] sm:$0xff]  ;;  %v2583_v28 = vld [vmem:[%s3657_s1 + $0x254] ss:$8 sps:$4 sm:$0xff]   ;;  %v312_v29 = vld [vmem:[%s2970_s17 + $0xe8] sm:$0xff] }
  0x33   : > { %1091 = vmatpush1.bf16.msra.mxu0 %v2522_v30  ;;  %v319_v30 = vld [vmem:[%s2970_s17 + $0x120] sm:$0xff]  ;;  %v333_v46 = vld [vmem:[%s2970_s17 + $0x190] sm:$0xff]  ;;  %v328_v47 = vld [vmem:[%s2970_s17 + $0x168] sm:$0xff] }
  0x34   : > { %1204 = vmatpush1.bf16.msra.mxu1 %v2523_v31  ;;  %1092 = vmatprep.subr.bf16.mxu0 %v2524_v32  ;;  %v314_v31 = vld [vmem:[%s2970_s17 + $0xf8] sm:$0xff]  ;;  %v321_v32 = vld [vmem:[%s2970_s17 + $0x130] sm:$0xff]  ;;  %v335_v48 = vld [vmem:[%s2970_s17 + $0x1a0] sm:$0xff] }
  0x35   : > { %1205 = vmatprep.subr.bf16.mxu1 %v2526_v33  ;;  %v402_v33 = vpack.c.bf16 %v304_v25, %v297_v24  ;;  %v2592_v53 = vld [vmem:[%s3657_s1 + $0x224] ss:$8 sps:$4 sm:$0xff]   ;;  %v419_v54 = vpack.c.bf16 %v335_v48, %v328_v47  ;;  %v2596_v7 = vld [vmem:[%s3657_s1 + $0x200] ss:$8 sps:$4 sm:$0xff]   ;;  %v346_v9 = vld [vmem:[%s2970_s17 + $0x1f8] sm:$0xff] }
  0x36   : > { %v339_v8 = vld [vmem:[%s2970_s17 + $0x1c0] sm:$0xff]  ;;  %v354_v13 = vld [vmem:[%s2970_s17 + $0x238] sm:$0xff]  ;;  %v361_v14 = vld [vmem:[%s2970_s17 + $0x270] sm:$0xff] }
  0x37   : > { %1093 = vmatpush2.bf16.msra.mxu0 %v2528_v34  ;;  %v404_v34 = vpack.c.bf16 %v306_v27, %v299_v26  ;;  %v423_v17 = vpack.c.bf16 %v346_v9, %v339_v8  ;;  %v353_v24 = vld [vmem:[%s2970_s17 + $0x230] sm:$0xff]  ;;  %v360_v25 = vld [vmem:[%s2970_s17 + $0x268] sm:$0xff]  ;;  %v355_v26 = vld [vmem:[%s2970_s17 + $0x240] sm:$0xff]  ;;  %v2737_v9 = vmov 0  }
  0x38   : > { %1206 = vmatpush2.bf16.msra.mxu1 %v2529_v35  ;;  %1094 = vmatprep.subr.bf16.mxu0 %v2530_v36  ;;  %v2581_v35 = vld [vmem:[%s3657_s1 + $0x250] ss:$8 sps:$4 sm:$0xff]   ;;  %v410_v36 = vpack.c.bf16 %v319_v30, %v312_v29  ;;  %v368_v29 = vld [vmem:[%s2970_s17 + $0x2a8] sm:$0xff]  ;;  %v375_v30 = vld [vmem:[%s2970_s17 + $0x2e0] sm:$0xff] }
  0x39   : > { %1207 = vmatprep.subr.bf16.mxu1 %v2532_v37  ;;  %v2586_v37 = vld [vmem:[%s3657_s1 + $0x244] ss:$8 sps:$4 sm:$0xff]   ;;  %v362_v27 = vld [vmem:[%s2970_s17 + $0x278] sm:$0xff] }
  0x3a   : > { %v384_v47 = vld [vmem:[%s2970_s17 + $0x328] sm:$0xff]  ;;  %v391_v48 = vld [vmem:[%s2970_s17 + $0x360] sm:$0xff] }
  0x3b   : > { %1095 = vmatpush2.bf16.msra.mxu0 %v2534_v38  ;;  %v412_v38 = vpack.c.bf16 %v321_v32, %v314_v31  ;;  %v2605_v31 = vld [vmem:[%s3657_s1 + $0x2d0] ss:$8 sps:$4 sm:$0xff]   ;;  %v296_v8 = vld [vmem:[%s2970_s17 + $0x68] sm:$0xff] }
  0x3c   : > { %1208 = vmatpush2.bf16.msra.mxu1 %v2535_v39  ;;  %1096 = vmatprep.subr.bf16.mxu0 %v2536_v40  ;;  %v2584_v39 = vld [vmem:[%s3657_s1 + $0x240] ss:$8 sps:$4 sm:$0xff]   ;;  %v370_v32 = vld [vmem:[%s2970_s17 + $0x2b8] sm:$0xff] }
  0x3d   : > { %1209 = vmatprep.subr.bf16.mxu1 %v2538_v41  ;;  %v311_v40 = vld [vmem:[%s2970_s17 + $0xe0] sm:$0xff]  ;;  %v318_v41 = vld [vmem:[%s2970_s17 + $0x118] sm:$0xff] }
  0x3e   : > { %v409_v49 = vpack.c.bf16 %v318_v41, %v311_v40  ;;  %v367_v40 = vld [vmem:[%s2970_s17 + $0x2a0] sm:$0xff]  ;;  %v374_v41 = vld [vmem:[%s2970_s17 + $0x2d8] sm:$0xff] }
  0x3f   : > { %1097 = vmatpush2.bf16.msra.mxu0 %v2540_v42  ;;  %v313_v42 = vld [vmem:[%s2970_s17 + $0xf0] sm:$0xff] }
  0x40   : > { %1210 = vmatpush2.bf16.msra.mxu1 %v2541_v43  ;;  %1098 = vmatprep.subr.bf16.mxu0 %v2542_v44  ;;  %v320_v43 = vld [vmem:[%s2970_s17 + $0x128] sm:$0xff]  ;;  %v2589_v44 = vld [vmem:[%s3657_s1 + $0x234] ss:$8 sps:$4 sm:$0xff]  }
  0x41   : > { %1211 = vmatprep.subr.bf16.mxu1 %v2544_v45  ;;  %v326_v45 = vld [vmem:[%s2970_s17 + $0x158] sm:$0xff] }
  0x43   : > { %1099 = vmatpush2.bf16.msra.mxu0 %v2546_v50  ;;  %v411_v50 = vpack.c.bf16 %v320_v43, %v313_v42  ;;  %v369_v42 = vld [vmem:[%s2970_s17 + $0x2b0] sm:$0xff]  ;;  %v376_v43 = vld [vmem:[%s2970_s17 + $0x2e8] sm:$0xff] }
  0x44   : > { %1212 = vmatpush2.bf16.msra.mxu1 %v2547_v51  ;;  %1100 = vmatprep.subr.bf16.mxu0 %v2548_v52  ;;  %v2587_v51 = vld [vmem:[%s3657_s1 + $0x230] ss:$8 sps:$4 sm:$0xff]   ;;  %v417_v52 = vpack.c.bf16 %v333_v46, %v326_v45 }
  0x45   : > { %1213 = vmatprep.subr.bf16.mxu1 %v2550_v55  ;;  %v2590_v55 = vld [vmem:[%s3657_s1 + $0x220] ss:$8 sps:$4 sm:$0xff]   ;;  %v382_v45 = vld [vmem:[%s2970_s17 + $0x318] sm:$0xff]  ;;  %v389_v46 = vld [vmem:[%s2970_s17 + $0x350] sm:$0xff] }
  0x47   : > { %1101 = vmatpush2.bf16.msra.mxu0 %v2552_v56  ;;  %v325_v56 = vld [vmem:[%s2970_s17 + $0x150] sm:$0xff] }
  0x48   : > { %1214 = vmatpush2.bf16.msra.mxu1 %v2553_v57  ;;  %1102 = vmatprep.subr.bf16.mxu0 %v2554_v58  ;;  %v332_v57 = vld [vmem:[%s2970_s17 + $0x188] sm:$0xff]  ;;  %v327_v58 = vld [vmem:[%s2970_s17 + $0x160] sm:$0xff] }
  0x49   : > { %1215 = vmatprep.subr.bf16.mxu1 %v2556_v59  ;;  %v334_v59 = vld [vmem:[%s2970_s17 + $0x198] sm:$0xff] }
  0x4b   : > { %1103 = vmatpush2.bf16.msra.mxu0 %v2558_v60  ;;  %v2595_v60 = vld [vmem:[%s3657_s1 + $0x214] ss:$8 sps:$4 sm:$0xff]  }
  0x4c   : > { %1216 = vmatpush2.bf16.msra.mxu1 %v2559_v61  ;;  %1104 = vmatprep.subr.bf16.mxu0 %v2560_v62  ;;  %v340_v61 = vld [vmem:[%s2970_s17 + $0x1c8] sm:$0xff]  ;;  %v347_v62 = vld [vmem:[%s2970_s17 + $0x200] sm:$0xff] }
  0x4d   : > { %1217 = vmatprep.subr.bf16.mxu1 %v2562_v63  ;;  %v342_v63 = vld [vmem:[%s2970_s17 + $0x1d8] sm:$0xff] }
  0x4f   : > { %1105 = vmatpush2.bf16.msra.mxu0 %v2564_v0  ;;  %v349_v0 = vld [vmem:[%s2970_s17 + $0x210] sm:$0xff] }
  0x50   : > { %1218 = vmatpush2.bf16.msra.mxu1 %v2565_v1  ;;  %1106 = vmatprep.subr.bf16.mxu0 %v2566_v2  ;;  %v416_v1 = vpack.c.bf16 %v332_v57, %v325_v56  ;;  %v418_v2 = vpack.c.bf16 %v334_v59, %v327_v58  ;;  %v426_v6 = vpack.c.bf16 %v349_v0, %v342_v63  ;;  %v381_v56 = vld [vmem:[%s2970_s17 + $0x310] sm:$0xff]  ;;  %v388_v57 = vld [vmem:[%s2970_s17 + $0x348] sm:$0xff]  ;;  %v383_v58 = vld [vmem:[%s2970_s17 + $0x320] sm:$0xff] }
  0x51   : > { %1219 = vmatprep.subr.bf16.mxu1 %v2568_v3  ;;  %v2593_v3 = vld [vmem:[%s3657_s1 + $0x210] ss:$8 sps:$4 sm:$0xff]   ;;  %v444_v63 = vpack.c.bf16 %v388_v57, %v381_v56  ;;  %v2632_v57 = vld [vmem:[%s3659_s3 + $0x40] ss:$8 sps:$4 sm:$0xff]  }
  0x52   : > { %v390_v59 = vld [vmem:[%s2970_s17 + $0x358] sm:$0xff] }
  0x53   : > { %1107 = vmatpush2.bf16.msra.mxu0 %v2570_v4  ;;  %v424_v4 = vpack.c.bf16 %v347_v62, %v340_v61  ;;  %v288_v61 = vld [vmem:[%s2970_s17 + $0x28] sm:$0xff]  ;;  %v295_v62 = vld [vmem:[%s2970_s17 + $0x60] sm:$0xff]  ;;  %v446_v0 = vpack.c.bf16 %v390_v59, %v383_v58  ;;  %v2637_v59 = vld [vmem:[%s3659_s3 + $0x34] ss:$8 sps:$4 sm:$0xff]  }
  0x54   : > { %1220 = vmatpush2.bf16.msra.mxu1 %v2571_v5  ;;  %1302 = vmatprep.subr.bf16.mxu0 %v2574_v10  ;;  %v2598_v5 = vld [vmem:[%s3657_s1 + $0x204] ss:$8 sps:$4 sm:$0xff]   ;;  %v341_v10 = vld [vmem:[%s2970_s17 + $0x1d0] sm:$0xff] }
  0x55   : > { %1429 = vmatprep.subr.bf16.mxu1 %v2577_v11  ;;  %v348_v11 = vld [vmem:[%s2970_s17 + $0x208] sm:$0xff] }
  0x56   : > { %1109 = vmatmul.mubr.bf16.vlgmr.msra.gmra.mxu0 %v395_v15  ;;  %v356_v15 = vld [vmem:[%s2970_s17 + $0x248] sm:$0xff]  ;;  %v425_v18 = vpack.c.bf16 %v348_v11, %v341_v10  ;;  %v302_v10 = vld [vmem:[%s2970_s17 + $0x98] sm:$0xff]  ;;  %v309_v11 = vld [vmem:[%s2970_s17 + $0xd0] sm:$0xff] }
  0x57   : > { %1222 = vmatmul.mubr.bf16.vlgmr.msra.gmra.mxu1 %v397_v16  ;;  %1303 = vmatpush1.bf16.msra.mxu0 %v2572_v12  ;;  %v2601_v12 = vld [vmem:[%s3657_s1 + $0x2f4] ss:$8 sps:$4 sm:$0xff]   ;;  %v363_v16 = vld [vmem:[%s2970_s17 + $0x280] sm:$0xff] }
  0x58   : > { %1430 = vmatpush1.bf16.msra.mxu1 %v2575_v19  ;;  %1304 = vmatprep.subr.bf16.mxu0 %v2580_v20  ;;  %v2599_v19 = vld [vmem:[%s3657_s1 + $0x2f0] ss:$8 sps:$4 sm:$0xff]   ;;  %v431_v20 = vpack.c.bf16 %v361_v14, %v354_v13  ;;  %v407_v14 = vpack.c.bf16 %v309_v11, %v302_v10  ;;  %v371_v10 = vld [vmem:[%s2970_s17 + $0x2c0] sm:$0xff] }
  0x59   : > { %1118 = vmatprep.mubr.bf16.mxu0 %v403_v21  ;;  %1231 = vmatprep.mubr.bf16.mxu1 %v405_v23  ;;  %v2604_v21 = vld [vmem:[%s3657_s1 + $0x2e4] ss:$8 sps:$4 sm:$0xff]   ;;  %v2602_v23 = vld [vmem:[%s3657_s1 + $0x2e0] ss:$8 sps:$4 sm:$0xff]   ;;  %v2641_v11 = vld [vmem:[%s3659_s3 + $0x10] ss:$8 sps:$4 sm:$0xff]  }
  0x5b   : > { %1305 = vmatpush1.bf16.msra.mxu0 %v2578_v22  ;;  %v433_v22 = vpack.c.bf16 %v363_v16, %v356_v15  ;;  %v301_v15 = vld [vmem:[%s2970_s17 + $0x90] sm:$0xff]  ;;  %v308_v16 = vld [vmem:[%s2970_s17 + $0xc8] sm:$0xff] }
  0x5c   : > { %1306 = vmatprep.subr.bf16.mxu0 %v2583_v28  ;;  %v2607_v28 = vld [vmem:[%s3657_s1 + $0x2d4] ss:$8 sps:$4 sm:$0xff]  }
  0x5e   : > { %1119 = vmatmul.mubr.bf16.gmra.mxu0 %v402_v33  ;;  %v377_v33 = vld [vmem:[%s2970_s17 + $0x2f0] sm:$0xff] }
  0x5f   : > { %1232 = vmatmul.mubr.bf16.gmra.mxu1 %v404_v34  ;;  %1307 = vmatpush1.bf16.msra.mxu0 %v2581_v35  ;;  %v430_v34 = vpack.c.bf16 %v360_v25, %v353_v24  ;;  %v432_v35 = vpack.c.bf16 %v362_v27, %v355_v26  ;;  %v315_v24 = vld [vmem:[%s2970_s17 + $0x100] sm:$0xff]  ;;  %v322_v25 = vld [vmem:[%s2970_s17 + $0x138] sm:$0xff]  ;;  %v317_v26 = vld [vmem:[%s2970_s17 + $0x110] sm:$0xff] }
  0x60   : > { %1128 = vmatprep.mubr.bf16.mxu0 %v410_v36  ;;  %1308 = vmatprep.subr.bf16.mxu0 %v2586_v37  ;;  %v2610_v36 = vld [vmem:[%s3657_s1 + $0x2c4] ss:$8 sps:$4 sm:$0xff]   ;;  %v438_v37 = vpack.c.bf16 %v375_v30, %v368_v29  ;;  %v337_v29 = vld [vmem:[%s2970_s17 + $0x1b0] sm:$0xff]  ;;  %v413_v30 = vpack.c.bf16 %v322_v25, %v315_v24 }
  0x61   : > { %1241 = vmatprep.mubr.bf16.mxu1 %v412_v38  ;;  %v440_v38 = vpack.c.bf16 %v377_v33, %v370_v32  ;;  %v324_v27 = vld [vmem:[%s2970_s17 + $0x148] sm:$0xff]  ;;  %v2625_v33 = vld [vmem:[%s3659_s3 + $0x74] ss:$8 sps:$4 sm:$0xff]   ;;  %v2647_v24 = vld [vmem:[%s3659_s3 + $0xf0] ss:$8 sps:$4 sm:$0xff]  }
  0x62   : > { %2403 = vmatprep.subr.bf16.mxu1 %v2625_v33  ;;  %v392_v25 = vld [vmem:[%s2970_s17 + $0x368] sm:$0xff] }
  0x63   : > { %1309 = vmatpush1.bf16.msra.mxu0 %v2584_v39  ;;  %v2608_v39 = vld [vmem:[%s3657_s1 + $0x2c0] ss:$8 sps:$4 sm:$0xff]  }
  0x64   : > { %1310 = vmatprep.subr.bf16.mxu0 %v2589_v44  ;;  %v2613_v44 = vld [vmem:[%s3657_s1 + $0x2b4] ss:$8 sps:$4 sm:$0xff]  }
  0x66   : > { %1129 = vmatmul.mubr.bf16.gmra.mxu0 %v409_v49  ;;  %v2611_v49 = vld [vmem:[%s3657_s1 + $0x2b0] ss:$8 sps:$4 sm:$0xff]  }
  0x67   : > { %1242 = vmatmul.mubr.bf16.gmra.mxu1 %v411_v50  ;;  %1311 = vmatpush1.bf16.msra.mxu0 %v2587_v51  ;;  %v437_v50 = vpack.c.bf16 %v374_v41, %v367_v40  ;;  %v439_v51 = vpack.c.bf16 %v376_v43, %v369_v42  ;;  %v351_v40 = vld [vmem:[%s2970_s17 + $0x220] sm:$0xff] }
  0x68   : > { %1138 = vmatprep.mubr.bf16.mxu0 %v417_v52  ;;  %1312 = vmatprep.subr.bf16.mxu0 %v2592_v53  ;;  %v445_v52 = vpack.c.bf16 %v389_v46, %v382_v45  ;;  %v2616_v53 = vld [vmem:[%s3657_s1 + $0x2a4] ss:$8 sps:$4 sm:$0xff]   ;;  %v2631_v46 = vld [vmem:[%s3659_s3 + $0x54] ss:$8 sps:$4 sm:$0xff]  }
  0x69   : > { %1251 = vmatprep.mubr.bf16.mxu1 %v419_v54  ;;  %v447_v54 = vpack.c.bf16 %v391_v48, %v384_v47  ;;  %v2628_v41 = vld [vmem:[%s3659_s3 + $0x64] ss:$8 sps:$4 sm:$0xff]   ;;  %v2629_v48 = vld [vmem:[%s3659_s3 + $0x50] ss:$8 sps:$4 sm:$0xff]  }
  0x6a   : > { %v343_v47 = vld [vmem:[%s2970_s17 + $0x1e0] sm:$0xff] }
  0x6b   : > { %1313 = vmatpush1.bf16.msra.mxu0 %v2590_v55  ;;  %v2614_v55 = vld [vmem:[%s3657_s1 + $0x2a0] ss:$8 sps:$4 sm:$0xff]  }
  0x6c   : > { %1314 = vmatprep.subr.bf16.mxu0 %v2595_v60  ;;  %v2619_v60 = vld [vmem:[%s3657_s1 + $0x294] ss:$8 sps:$4 sm:$0xff]  }
  0x6e   : > { %1139 = vmatmul.mubr.bf16.gmra.mxu0 %v416_v1  ;;  %v2617_v1 = vld [vmem:[%s3657_s1 + $0x290] ss:$8 sps:$4 sm:$0xff]  }
  0x6f   : > { %1252 = vmatmul.mubr.bf16.gmra.mxu1 %v418_v2  ;;  %1315 = vmatpush1.bf16.msra.mxu0 %v2593_v3  ;;  %v400_v2 = vpack.c.bf16 %v295_v62, %v288_v61  ;;  %v2622_v3 = vld [vmem:[%s3657_s1 + $0x284] ss:$8 sps:$4 sm:$0xff]   ;;  %v2635_v61 = vld [vmem:[%s3659_s3 + $0x30] ss:$8 sps:$4 sm:$0xff]  }
  0x70   : > { %1148 = vmatprep.mubr.bf16.mxu0 %v424_v4  ;;  %1316 = vmatprep.subr.bf16.mxu0 %v2598_v5  ;;  %v2620_v4 = vld [vmem:[%s3657_s1 + $0x280] ss:$8 sps:$4 sm:$0xff]  }
  0x71   : > { %1261 = vmatprep.mubr.bf16.mxu1 %v426_v6  ;;  %v287_v5 = vld [vmem:[%s2970_s17 + $0x20] sm:$0xff]  ;;  %v294_v6 = vld [vmem:[%s2970_s17 + $0x58] sm:$0xff]  ;;  %v364_v62 = vld [vmem:[%s2970_s17 + $0x288] sm:$0xff] }
  0x73   : > { %1317 = vmatpush1.bf16.msra.mxu0 %v2596_v7  ;;  %v289_v7 = vld [vmem:[%s2970_s17 + $0x30] sm:$0xff] }
  0x74   : > { %1318 = vmatprep.subr.bf16.mxu0 %v2601_v12  ;;  %v399_v12 = vpack.c.bf16 %v294_v6, %v287_v5  ;;  %v401_v13 = vpack.c.bf16 %v296_v8, %v289_v7  ;;  %v2638_v6 = vld [vmem:[%s3659_s3 + $0x20] ss:$8 sps:$4 sm:$0xff]   ;;  %v2643_v8 = vld [vmem:[%s3659_s3 + $0x14] ss:$8 sps:$4 sm:$0xff]  }
  0x76   : > { %1149 = vmatmul.mubr.bf16.gmra.mxu0 %v423_v17  ;;  %v303_v17 = vld [vmem:[%s2970_s17 + $0xa0] sm:$0xff] }
  0x77   : > { %1262 = vmatmul.mubr.bf16.gmra.mxu1 %v425_v18  ;;  %1319 = vmatpush2.bf16.msra.mxu0 %v2599_v19  ;;  %v310_v18 = vld [vmem:[%s2970_s17 + $0xd8] sm:$0xff]  ;;  %v316_v19 = vld [vmem:[%s2970_s17 + $0x108] sm:$0xff] }
  0x78   : > { %1158 = vmatprep.mubr.bf16.mxu0 %v431_v20  ;;  %1320 = vmatprep.subr.bf16.mxu0 %v2604_v21  ;;  %v323_v20 = vld [vmem:[%s2970_s17 + $0x140] sm:$0xff]  ;;  %v406_v21 = vpack.c.bf16 %v308_v16, %v301_v15  ;;  %v386_v15 = vld [vmem:[%s2970_s17 + $0x338] sm:$0xff]  ;;  %v393_v16 = vld [vmem:[%s2970_s17 + $0x370] sm:$0xff] }
  0x79   : > { %1271 = vmatprep.mubr.bf16.mxu1 %v433_v22  ;;  %v408_v22 = vpack.c.bf16 %v310_v18, %v303_v17  ;;  %v2646_v17 = vld [vmem:[%s3659_s3 + $0x4] ss:$8 sps:$4 sm:$0xff]  }
  0x7b   : > { %1321 = vmatpush2.bf16.msra.mxu0 %v2602_v23  ;;  %v414_v23 = vpack.c.bf16 %v323_v20, %v316_v19  ;;  %v2644_v20 = vld [vmem:[%s3659_s3] ss:$8 sps:$4 sm:$0xff]  }
  0x7c   : > { %1322 = vmatprep.subr.bf16.mxu0 %v2607_v28  ;;  %v330_v28 = vld [vmem:[%s2970_s17 + $0x178] sm:$0xff] }
  0x7d   : > { %v421_v32 = vpack.c.bf16 %v337_v29, %v330_v28  ;;  %v2652_v28 = vld [vmem:[%s3659_s3 + $0xe4] ss:$8 sps:$4 sm:$0xff]  }
  0x7e   : > { %1159 = vmatmul.mubr.bf16.gmra.mxu0 %v430_v34  ;;  %v329_v34 = vld [vmem:[%s2970_s17 + $0x170] sm:$0xff] }
  0x7f   : > { %1272 = vmatmul.mubr.bf16.gmra.mxu1 %v432_v35  ;;  %1323 = vmatpush2.bf16.msra.mxu0 %v2605_v31  ;;  %v415_v31 = vpack.c.bf16 %v324_v27, %v317_v26  ;;  %v2623_v35 = vld [vmem:[%s3659_s3 + $0x70] ss:$8 sps:$4 sm:$0xff]   ;;  %v387_v26 = vld [vmem:[%s2970_s17 + $0x340] sm:$0xff] }
  0x80   : > { %1168 = vmatprep.mubr.bf16.mxu0 %v438_v37  ;;  %1324 = vmatprep.subr.bf16.mxu0 %v2610_v36  ;;  %v336_v36 = vld [vmem:[%s2970_s17 + $0x1a8] sm:$0xff]  ;;  %v331_v37 = vld [vmem:[%s2970_s17 + $0x180] sm:$0xff]  ;;  %v394_v27 = vld [vmem:[%s2970_s17 + $0x378] sm:$0xff] }
  0x81   : > { %1281 = vmatprep.mubr.bf16.mxu1 %v440_v38  ;;  %v338_v38 = vld [vmem:[%s2970_s17 + $0x1b8] sm:$0xff]  ;;  %v420_v42 = vpack.c.bf16 %v336_v36, %v329_v34  ;;  %v2656_v34 = vld [vmem:[%s3659_s3 + $0xc0] ss:$8 sps:$4 sm:$0xff]  }
  0x82   : > { %v422_v43 = vpack.c.bf16 %v338_v38, %v331_v37  ;;  %v2659_v36 = vld [vmem:[%s3659_s3 + $0xb0] ss:$8 sps:$4 sm:$0xff]   ;;  %v2664_v37 = vld [vmem:[%s3659_s3 + $0xa4] ss:$8 sps:$4 sm:$0xff]   ;;  %v2662_v38 = vld [vmem:[%s3659_s3 + $0xa0] ss:$8 sps:$4 sm:$0xff]  }
  0x83   : > { %1325 = vmatpush2.bf16.msra.mxu0 %v2608_v39  ;;  %v344_v39 = vld [vmem:[%s2970_s17 + $0x1e8] sm:$0xff] }
  0x84   : > { %1326 = vmatprep.subr.bf16.mxu0 %v2613_v44  ;;  %v2626_v44 = vld [vmem:[%s3659_s3 + $0x60] ss:$8 sps:$4 sm:$0xff]   ;;  %v428_v45 = vpack.c.bf16 %v351_v40, %v344_v39  ;;  %v2667_v39 = vld [vmem:[%s3659_s3 + $0x94] ss:$8 sps:$4 sm:$0xff]   ;;  %v2665_v40 = vld [vmem:[%s3659_s3 + $0x90] ss:$8 sps:$4 sm:$0xff]  }
  0x86   : > { %1169 = vmatmul.mubr.bf16.gmra.mxu0 %v437_v50  ;;  %v345_v50 = vld [vmem:[%s2970_s17 + $0x1f0] sm:$0xff] }
  0x87   : > { %1282 = vmatmul.mubr.bf16.gmra.mxu1 %v439_v51  ;;  %1327 = vmatpush2.bf16.msra.mxu0 %v2611_v49  ;;  %v350_v49 = vld [vmem:[%s2970_s17 + $0x218] sm:$0xff]  ;;  %v352_v51 = vld [vmem:[%s2970_s17 + $0x228] sm:$0xff] }
  0x88   : > { %1178 = vmatprep.mubr.bf16.mxu0 %v445_v52  ;;  %1328 = vmatprep.subr.bf16.mxu0 %v2616_v53  ;;  %v358_v52 = vld [vmem:[%s2970_s17 + $0x258] sm:$0xff]  ;;  %v365_v53 = vld [vmem:[%s2970_s17 + $0x290] sm:$0xff]  ;;  %v429_v56 = vpack.c.bf16 %v352_v51, %v345_v50 }
  0x89   : > { %1291 = vmatprep.mubr.bf16.mxu1 %v447_v54  ;;  %v2634_v54 = vld [vmem:[%s3659_s3 + $0x44] ss:$8 sps:$4 sm:$0xff]   ;;  %v435_v58 = vpack.c.bf16 %v365_v53, %v358_v52 }
  0x8b   : > { %1329 = vmatpush2.bf16.msra.mxu0 %v2614_v55  ;;  %v427_v55 = vpack.c.bf16 %v350_v49, %v343_v47 }
  0x8c   : > { %1330 = vmatprep.subr.bf16.mxu0 %v2619_v60  ;;  %v357_v60 = vld [vmem:[%s2970_s17 + $0x250] sm:$0xff] }
  0x8e   : > { %1179 = vmatmul.mubr.bf16.gmra.mxu0 %v444_v63  ;;  %v359_v63 = vld [vmem:[%s2970_s17 + $0x260] sm:$0xff] }
  0x8f   : > { %1292 = vmatmul.mubr.bf16.gmra.mxu1 %v446_v0  ;;  %1331 = vmatpush2.bf16.msra.mxu0 %v2617_v1  ;;  %v366_v0 = vld [vmem:[%s2970_s17 + $0x298] sm:$0xff]  ;;  %v372_v1 = vld [vmem:[%s2970_s17 + $0x2c8] sm:$0xff] }
  0x90   : > { %1334 = vmatprep.mubr.bf16.mxu0 %v400_v2  ;;  %1332 = vmatprep.subr.bf16.mxu0 %v2622_v3  ;;  %v379_v2 = vld [vmem:[%s2970_s17 + $0x300] sm:$0xff]  ;;  %v436_v5 = vpack.c.bf16 %v366_v0, %v359_v63 }
  0x91   : > { %1447 = vmatprep.mubr.bf16.mxu1 %v2737_v9  ;;  %v2640_v3 = vld [vmem:[%s3659_s3 + $0x24] ss:$8 sps:$4 sm:$0xff]   ;;  %v442_v7 = vpack.c.bf16 %v379_v2, %v372_v1 }
  0x93   : > { %1333 = vmatpush2.bf16.msra.mxu0 %v2620_v4  ;;  %v434_v4 = vpack.c.bf16 %v364_v62, %v357_v60 }
  0x94   : > { %1844 = vmatprep.subr.bf16.mxu0 %v2625_v33  ;;  %v2658_v33 = vld [vmem:[%s3659_s3 + $0xc4] ss:$8 sps:$4 sm:$0xff]  }
  0x96   : > { %1335 = vmatmul.mubr.bf16.vlgmr.msra.gmra.mxu0 %v399_v12  ;;  %v378_v12 = vld [vmem:[%s2970_s17 + $0x2f8] sm:$0xff] }
  0x97   : > { %2359 = vmatmul.mubr.msk.bf16.vlgmr.msra.gmra.mxu1 %vm1051_vm0, %v401_v13  ;;  %1344 = vmatprep.mubr.bf16.mxu0 %v407_v14  ;;  %v373_v13 = vld [vmem:[%s2970_s17 + $0x2d0] sm:$0xff]  ;;  %v380_v14 = vld [vmem:[%s2970_s17 + $0x308] sm:$0xff]  ;;  %v441_v18 = vpack.c.bf16 %v378_v12, %v371_v10 }
  0x98   : > { %1457 = vmatprep.mubr.bf16.mxu1 %v2737_v9  ;;  %1845 = vmatpush1.bf16.msra.mxu0 %v2623_v35  ;;  %v443_v19 = vpack.c.bf16 %v380_v14, %v373_v13 }
  0x99   : > { %2419 = vmatpush1.bf16.msra.mxu1 %v2623_v35  ;;  %1846 = vmatprep.subr.bf16.mxu0 %v2628_v41  ;;  %v2661_v35 = vld [vmem:[%s3659_s3 + $0xb4] ss:$8 sps:$4 sm:$0xff]  }
  0x9a   : > { %2404 = vmatprep.subr.bf16.mxu1 %v2628_v41  ;;  %v2670_v41 = vld [vmem:[%s3659_s3 + $0x84] ss:$8 sps:$4 sm:$0xff]  }
  0x9c   : > { %1847 = vmatpush1.bf16.msra.mxu0 %v2626_v44 }
  0x9d   : > { %2420 = vmatpush1.bf16.msra.mxu1 %v2626_v44  ;;  %1848 = vmatprep.subr.bf16.mxu0 %v2631_v46 }
  0x9e   : > { %1345 = vmatmul.mubr.bf16.gmra.mxu0 %v406_v21  ;;  %2405 = vmatprep.subr.bf16.mxu1 %v2631_v46  ;;  %v449_v21 = vpack.c.bf16 %v393_v16, %v386_v15  ;;  %v549_v46 = vld [vmem:[%s3658_s2] sm:$0x3] }
  0x9f   : > { %2360 = vmatmul.mubr.msk.bf16.gmra.mxu1 %vm1051_vm0, %v408_v22  ;;  %1354 = vmatprep.mubr.bf16.mxu0 %v414_v23  ;;  %v2649_v22 = vld [vmem:[%s3659_s3 + $0xf4] ss:$8 sps:$4 sm:$0xff]  }
  0xa0   : > { %1467 = vmatprep.mubr.bf16.mxu1 %v2737_v9  ;;  %1849 = vmatpush1.bf16.msra.mxu0 %v2629_v48  ;;  %v385_v23 = vld [vmem:[%s2970_s17 + $0x330] sm:$0xff]  ;;  %s274_s17 = scalar_lea.vmem [#allocation3], %s273_s10 }
  0xa1   : > { %2421 = vmatpush1.bf16.msra.mxu1 %v2629_v48  ;;  %1850 = vmatprep.subr.bf16.mxu0 %v2634_v54  ;;  %v448_v29 = vpack.c.bf16 %v392_v25, %v385_v23  ;;  %s2200_s30 = sshll.u32 %s274_s17, 4  ;;  %s2201_s30 = int_to_ptr.vmem [resolvable:$true] %s2200_s30 }
  0xa2   : > { %2406 = vmatprep.subr.bf16.mxu1 %v2634_v54  ;;  %s2675_s19 = scalar_lea.vmem %s2201_s30, 16  ;;  %p2682_p0 = scmp.lt.s32.totalorder %s2201_s30, %s2680_s21 }
  0xa3   : > { %p2676_p11 = scmp.ne.s32.totalorder %s2201_s30, %s2675_s19  ;;  %p2683_p1 = scmp.lt.s32.totalorder %s2681_s6, %s2675_s19 }
  0xa4   : > { %1851 = vmatpush1.bf16.msra.mxu0 %v2632_v57 }
  0xa5   : > { %2422 = vmatpush1.bf16.msra.mxu1 %v2632_v57  ;;  %1852 = vmatprep.subr.bf16.mxu0 %v2637_v59  ;;  %p2677_p12 = pnand %p2676_p11, %p2819_p5  ;;  %p2684_p2 = por %p2683_p1, %p2682_p0 }
  0xa6   : > { %1355 = vmatmul.mubr.bf16.gmra.mxu0 %v413_v30  ;;  %2407 = vmatprep.subr.bf16.mxu1 %v2637_v59  ;;  %v450_v30 = vpack.c.bf16 %v394_v27, %v387_v26 }
  0xa7   : > { %2361 = vmatmul.mubr.msk.bf16.gmra.mxu1 %vm1051_vm0, %v415_v31  ;;  %1364 = vmatprep.mubr.bf16.mxu0 %v421_v32  ;;  %v2650_v31 = vld [vmem:[%s3659_s3 + $0xe0] ss:$8 sps:$4 sm:$0xff]   ;;  %v2653_v32 = vld [vmem:[%s3659_s3 + $0xd0] ss:$8 sps:$4 sm:$0xff]   ;;  %p2678_p13 = pneg %p2677_p12 }
  0xa8   : > { %1477 = vmatprep.mubr.bf16.mxu1 %v2737_v9  ;;  %1853 = vmatpush1.bf16.msra.mxu0 %v2635_v61 }
  0xa9   : > { %2423 = vmatpush1.bf16.msra.mxu1 %v2635_v61  ;;  %1854 = vmatprep.subr.bf16.mxu0 %v2640_v3  ;;  %p2685_p3 = pnand %p2684_p2, %p2678_p13 }
  0xaa   : > { %2408 = vmatprep.subr.bf16.mxu1 %v2640_v3 }
  0xac   : > { %1855 = vmatpush1.bf16.msra.mxu0 %v2638_v6 }
  0xad   : > { %2424 = vmatpush1.bf16.msra.mxu1 %v2638_v6  ;;  %1856 = vmatprep.subr.bf16.mxu0 %v2643_v8 }
  0xae   : > { %1365 = vmatmul.mubr.bf16.gmra.mxu0 %v420_v42  ;;  %2409 = vmatprep.subr.bf16.mxu1 %v2643_v8  ;;  %v2668_v42 = vld [vmem:[%s3659_s3 + $0x80] ss:$8 sps:$4 sm:$0xff]  }
  0xaf   : > { %2362 = vmatmul.mubr.msk.bf16.gmra.mxu1 %vm1051_vm0, %v422_v43  ;;  %1374 = vmatprep.mubr.bf16.mxu0 %v428_v45  ;;  %v551_v43 = vlaneseq }
  0xb0   : > { %1487 = vmatprep.mubr.bf16.mxu1 %v2737_v9  ;;  %1857 = vmatpush1.bf16.msra.mxu0 %v2641_v11 }
  0xb1   : > { %2425 = vmatpush1.bf16.msra.mxu1 %v2641_v11  ;;  %1858 = vmatprep.subr.bf16.mxu0 %v2646_v17  ;;  %v552_v44 = vshrl.u32 %v551_v43, 7 }
  0xb2   : > { %2410 = vmatprep.subr.bf16.mxu1 %v2646_v17 }
  0xb3   : > { %v3358_v45 = vsub.s32 0, %v552_v44  ;;  %v3363_v47 = vsub.s32 1, %v552_v44 }
  0xb4   : > { %1859 = vmatpush1.bf16.msra.mxu0 %v2644_v20 }
  0xb5   : > { %2426 = vmatpush1.bf16.msra.mxu1 %v2644_v20  ;;  %1860 = vmatprep.subr.bf16.mxu0 %v2649_v22  ;;  %v3366_v48 = vrot.slane %v549_v46, %v3358_v45  ;;  %v3369_v49 = vrot.slane %v549_v46, %v3363_v47 }
  0xb6   : > { %1375 = vmatmul.mubr.bf16.gmra.mxu0 %v427_v55  ;;  %2411 = vmatprep.subr.bf16.mxu1 %v2649_v22 }
  0xb7   : > { %2363 = vmatmul.mubr.msk.bf16.gmra.mxu1 %vm1051_vm0, %v429_v56  ;;  %1384 = vmatprep.mubr.bf16.mxu0 %v435_v58 }
  0xb8   : > { %1497 = vmatprep.mubr.bf16.mxu1 %v2737_v9  ;;  %1861 = vmatpush2.bf16.msra.mxu0 %v2647_v24 }
  0xb9   : > { %2427 = vmatpush2.bf16.msra.mxu1 %v2647_v24  ;;  %1862 = vmatprep.subr.bf16.mxu0 %v2652_v28 }
  0xba   : > { %2412 = vmatprep.subr.bf16.mxu1 %v2652_v28 }
  0xbc   : > { %1863 = vmatpush2.bf16.msra.mxu0 %v2650_v31 }
  0xbd   : > { %2428 = vmatpush2.bf16.msra.mxu1 %v2650_v31 }
  0xbe   : > { %1385 = vmatmul.mubr.bf16.gmra.mxu0 %v434_v4 }
  0xbf   : > { %2364 = vmatmul.mubr.msk.bf16.gmra.mxu1 %vm1051_vm0, %v436_v5  ;;  %1394 = vmatprep.mubr.bf16.mxu0 %v442_v7 }
  0xc0   : > { %1507 = vmatprep.mubr.bf16.mxu1 %v2737_v9 }
  0xc6   : > { %1395 = vmatmul.mubr.bf16.gmra.mxu0 %v441_v18 }
  0xc7   : > { %2365 = vmatmul.mubr.msk.bf16.gmra.mxu1 %vm1051_vm0, %v443_v19  ;;  %1404 = vmatprep.mubr.bf16.mxu0 %v449_v21 }
  0xc8   : > { %1517 = vmatprep.mubr.bf16.mxu1 %v2737_v9  ;;  %v2655_v9 = vld [vmem:[%s3659_s3 + $0xd4] ss:$8 sps:$4 sm:$0xff]  }
  0xc9   : > { %1864 = vmatprep.subr.bf16.mxu0 %v2655_v9  ;;  %2413 = vmatprep.subr.bf16.mxu1 %v2655_v9 }
  0xca   : > { %1865 = vmatpush2.bf16.msra.mxu0 %v2653_v32  ;;  %2429 = vmatpush2.bf16.msra.mxu1 %v2653_v32 }
  0xcb   : > { %1866 = vmatprep.subr.bf16.mxu0 %v2658_v33  ;;  %2414 = vmatprep.subr.bf16.mxu1 %v2658_v33 }
  0xce   : > { %1405 = vmatmul.mubr.bf16.gmra.mxu0 %v448_v29  ;;  %2430 = vmatpush2.bf16.msra.mxu1 %v2656_v34 }
  0xcf   : > { %2366 = vmatmul.mubr.msk.bf16.gmra.mxu1 %vm1051_vm0, %v450_v30  ;;  %1867 = vmatpush2.bf16.msra.mxu0 %v2656_v34 }
  0xd0   : > { %1868 = vmatprep.subr.bf16.mxu0 %v2661_v35  ;;  %2415 = vmatprep.subr.bf16.mxu1 %v2661_v35 }
  0xd2   : > { %2431 = vmatpush2.bf16.msra.mxu1 %v2659_v36 }
  0xd3   : > { %1869 = vmatpush2.bf16.msra.mxu0 %v2659_v36  ;;  %2416 = vmatprep.subr.bf16.mxu1 %v2664_v37 }
  0xd4   : > { %1870 = vmatprep.subr.bf16.mxu0 %v2664_v37 }
  0xd6   : > { %2432 = vmatpush2.bf16.msra.mxu1 %v2662_v38 }
  0xd7   : > { %1871 = vmatpush2.bf16.msra.mxu0 %v2662_v38  ;;  %2417 = vmatprep.subr.bf16.mxu1 %v2667_v39 }
  0xd8   : > { %1872 = vmatprep.subr.bf16.mxu0 %v2667_v39 }
  0xda   : > { %2433 = vmatpush2.bf16.msra.mxu1 %v2665_v40 }
  0xdb   : > { %1873 = vmatpush2.bf16.msra.mxu0 %v2665_v40  ;;  %2418 = vmatprep.subr.bf16.mxu1 %v2670_v41 }
  0xdc   : > { %1874 = vmatprep.subr.bf16.mxu0 %v2670_v41 }
  0xde   : > { %2434 = vmatpush2.bf16.msra.mxu1 %v2668_v42 }
  0xdf   : > { %1875 = vmatpush2.bf16.msra.mxu0 %v2668_v42 }
 0x116   : > { %v1110_v50 = vpop.f32.mrf.mxu0 }
 0x117   : > { %v1223_v51 = vpop.f32.mrf.mxu1  ;;  %v1111_v52 = vadd.f32 %v1110_v50, %v3366_v48 }
 0x118   : > { %v1112_v53 = vpop.f32.mrf.mxu0 }
 0x119   : > { %v1225_v54 = vpop.f32.mrf.mxu1  ;;  %v3372_v55 = vadd.f32 %v1223_v51, %v1111_v52  ;;  %v1113_v56 = vadd.f32 %v1112_v53, %v3369_v49 }
 0x11a   : > { %v1114_v57 = vpop.f32.mrf.mxu0 }
 0x11b   : > { %v1227_v58 = vpop.f32.mrf.mxu1  ;;  %v3375_v59 = vadd.f32 %v1225_v54, %v1113_v56  ;;  %v1115_v60 = vadd.f32 %v1114_v57, %v3366_v48 }
 0x11c   : > { %v3378_v61 = vpop.f32.mrf.mxu0 }
 0x11d   : > { %v3380_v62 = vpop.f32.mrf.mxu1  ;;  %v3382_v63 = vadd.f32 %v1227_v58, %v1115_v60 }
 0x11e   : > { %v1120_v0 = vpop.f32.mrf.mxu0 }
 0x11f   : > { %v1233_v1 = vpop.f32.mrf.mxu1  ;;  %v1121_v2 = vadd.f32 %v1120_v0, %v3366_v48 }
 0x120   : > { %v1122_v3 = vpop.f32.mrf.mxu0 }
 0x121   : > { %v1235_v4 = vpop.f32.mrf.mxu1  ;;  %v3385_v5 = vadd.f32 %v1233_v1, %v1121_v2  ;;  %v1123_v6 = vadd.f32 %v1122_v3, %v3369_v49 }
 0x122   : > { %v1124_v7 = vpop.f32.mrf.mxu0 }
 0x123   : > { %v1237_v8 = vpop.f32.mrf.mxu1  ;;  %v3388_v10 = vadd.f32 %v1235_v4, %v1123_v6  ;;  %v1125_v11 = vadd.f32 %v1124_v7, %v3366_v48 }
 0x124   : > { %v3391_v12 = vpop.f32.mrf.mxu0 }
 0x125   : > { %v3393_v13 = vpop.f32.mrf.mxu1  ;;  %v3395_v14 = vadd.f32 %v1237_v8, %v1125_v11 }
 0x126   : > { %v1130_v15 = vpop.f32.mrf.mxu0 }
 0x127   : > { %v1243_v16 = vpop.f32.mrf.mxu1  ;;  %v1131_v17 = vadd.f32 %v1130_v15, %v3366_v48 }
 0x128   : > { %v1132_v18 = vpop.f32.mrf.mxu0 }
 0x129   : > { %v1245_v19 = vpop.f32.mrf.mxu1  ;;  %v3398_v20 = vadd.f32 %v1243_v16, %v1131_v17  ;;  %v1133_v21 = vadd.f32 %v1132_v18, %v3369_v49 }
 0x12a   : > { %v1134_v22 = vpop.f32.mrf.mxu0 }
 0x12b   : > { %v1247_v23 = vpop.f32.mrf.mxu1  ;;  %v3401_v24 = vadd.f32 %v1245_v19, %v1133_v21  ;;  %v1135_v25 = vadd.f32 %v1134_v22, %v3366_v48 }
 0x12c   : > { %v3404_v26 = vpop.f32.mrf.mxu0 }
 0x12d   : > { %v3406_v27 = vpop.f32.mrf.mxu1  ;;  %v3408_v28 = vadd.f32 %v1247_v23, %v1135_v25 }
 0x12e   : > { %v1140_v29 = vpop.f32.mrf.mxu0 }
 0x12f   : > { %v1253_v30 = vpop.f32.mrf.mxu1  ;;  %v1141_v31 = vadd.f32 %v1140_v29, %v3366_v48 }
 0x130   : > { %v1142_v9 = vpop.f32.mrf.mxu0 }
 0x131   : > { %v1255_v32 = vpop.f32.mrf.mxu1  ;;  %v3411_v33 = vadd.f32 %v1253_v30, %v1141_v31  ;;  %v1143_v34 = vadd.f32 %v1142_v9, %v3369_v49 }
 0x132   : > { %v1144_v35 = vpop.f32.mrf.mxu0 }
 0x133   : > { %v1257_v36 = vpop.f32.mrf.mxu1  ;;  %v3414_v37 = vadd.f32 %v1255_v32, %v1143_v34  ;;  %v1145_v38 = vadd.f32 %v1144_v35, %v3366_v48 }
 0x134   : > { %v3417_v39 = vpop.f32.mrf.mxu0 }
 0x135   : > { %v3419_v40 = vpop.f32.mrf.mxu1  ;;  %v3421_v41 = vadd.f32 %v1257_v36, %v1145_v38 }
 0x136   : > { %v1150_v42 = vpop.f32.mrf.mxu0 }
 0x137   : > { %v1263_v43 = vpop.f32.mrf.mxu1  ;;  %v1151_v44 = vadd.f32 %v1150_v42, %v3366_v48 }
 0x138   : > { %v1152_v46 = vpop.f32.mrf.mxu0 }
 0x139   : > { %v1265_v50 = vpop.f32.mrf.mxu1  ;;  %v3424_v51 = vadd.f32 %v1263_v43, %v1151_v44  ;;  %v1153_v52 = vadd.f32 %v1152_v46, %v3369_v49 }
 0x13a   : > { %v1154_v53 = vpop.f32.mrf.mxu0 }
 0x13b   : > { %v1267_v54 = vpop.f32.mrf.mxu1  ;;  %v3427_v56 = vadd.f32 %v1265_v50, %v1153_v52  ;;  %v1155_v57 = vadd.f32 %v1154_v53, %v3366_v48 }
 0x13c   : > { %v3430_v58 = vpop.f32.mrf.mxu0 }
 0x13d   : > { %v3432_v60 = vpop.f32.mrf.mxu1  ;;  %v3434_v0 = vadd.f32 %v1267_v54, %v1155_v57 }
 0x13e   : > { %v1160_v1 = vpop.f32.mrf.mxu0 }
 0x13f   : > { %v1273_v2 = vpop.f32.mrf.mxu1  ;;  %v1161_v3 = vadd.f32 %v1160_v1, %v3366_v48 }
 0x140   : > { %v1162_v4 = vpop.f32.mrf.mxu0 }
 0x141   : > { %v1275_v6 = vpop.f32.mrf.mxu1  ;;  %v3437_v7 = vadd.f32 %v1273_v2, %v1161_v3  ;;  %v1163_v8 = vadd.f32 %v1162_v4, %v3369_v49 }
 0x142   : > { %v1164_v11 = vpop.f32.mrf.mxu0 }
 0x143   : > { %v1277_v15 = vpop.f32.mrf.mxu1  ;;  %v3440_v16 = vadd.f32 %v1275_v6, %v1163_v8  ;;  %v1165_v17 = vadd.f32 %v1164_v11, %v3366_v48 }
 0x144   : > { %v3443_v18 = vpop.f32.mrf.mxu0 }
 0x145   : > { %v3445_v19 = vpop.f32.mrf.mxu1  ;;  %v3447_v21 = vadd.f32 %v1277_v15, %v1165_v17 }
 0x146   : > { %v1170_v22 = vpop.f32.mrf.mxu0 }
 0x147   : > { %v1283_v23 = vpop.f32.mrf.mxu1  ;;  %v1171_v25 = vadd.f32 %v1170_v22, %v3366_v48 }
 0x148   : > { %v1172_v29 = vpop.f32.mrf.mxu0 }
 0x149   : > { %v1285_v30 = vpop.f32.mrf.mxu1  ;;  %v3450_v31 = vadd.f32 %v1283_v23, %v1171_v25  ;;  %v1173_v9 = vadd.f32 %v1172_v29, %v3369_v49  ;;  %v1117_v23 = vadd.f32 %v3378_v61, %v3369_v49 }
 0x14a   : > { %v1174_v32 = vpop.f32.mrf.mxu0 }
 0x14b   : > { %v1287_v34 = vpop.f32.mrf.mxu1  ;;  %v3453_v35 = vadd.f32 %v1285_v30, %v1173_v9  ;;  %v1175_v36 = vadd.f32 %v1174_v32, %v3366_v48 }
 0x14c   : > { %v3456_v38 = vpop.f32.mrf.mxu0 }
 0x14d   : > { %v3458_v42 = vpop.f32.mrf.mxu1  ;;  %v3460_v43 = vadd.f32 %v1287_v34, %v1175_v36  ;;  %v1230_v36 = vadd.f32 %v3380_v62, %v1117_v23 }
 0x14e   : > { %v1180_v44 = vpop.f32.mrf.mxu0 }
 0x14f   : > { %v1293_v46 = vpop.f32.mrf.mxu1  ;;  %v1181_v50 = vadd.f32 %v1180_v44, %v3366_v48 }
 0x150   : > { %v1182_v52 = vpop.f32.mrf.mxu0 }
 0x151   : > { %v1295_v53 = vpop.f32.mrf.mxu1  ;;  %v3463_v54 = vadd.f32 %v1293_v46, %v1181_v50  ;;  %v1183_v57 = vadd.f32 %v1182_v52, %v3369_v49 }
 0x152   : > { %v1184_v1 = vpop.f32.mrf.mxu0 }
 0x153   : > { %v1297_v2 = vpop.f32.mrf.mxu1  ;;  %v3466_v3 = vadd.f32 %v1295_v53, %v1183_v57  ;;  %v1185_v4 = vadd.f32 %v1184_v1, %v3366_v48  ;;  %v1127_v1 = vadd.f32 %v3391_v12, %v3369_v49 }
 0x154   : > { %v3469_v6 = vpop.f32.mrf.mxu0 }
 0x155   : > { %v3471_v8 = vpop.f32.mrf.mxu1  ;;  %v3473_v11 = vadd.f32 %v1297_v2, %v1185_v4  ;;  %v1240_v12 = vadd.f32 %v3393_v13, %v1127_v1 }
 0x156   : > { %v1336_v15 = vpop.f32.mrf.mxu0 }
 0x157   : > { %v1449_v17 = vpop.f32.mrf.mxu1  ;;  %v1337_v22 = vadd.f32 %v1336_v15, %v3372_v55 }
 0x158   : > { %v1338_v25 = vpop.f32.mrf.mxu0 }
 0x159   : > { %v1451_v29 = vpop.f32.mrf.mxu1  ;;  %v1450_v30 = vadd.f32 %v1449_v17, %v1337_v22  ;;  %v1339_v9 = vadd.f32 %v1338_v25, %v3375_v59 }
 0x15a   : > { %v1340_v32 = vpop.f32.mrf.mxu0 }
 0x15b   : > { %v1453_v48 = vpop.f32.mrf.mxu1  ;;  %v1341_v34 = vadd.f32 %v1340_v32, %v3382_v63  ;;  %v1560_v44 = vmul.f32 0.2, %v1450_v30  ;;  %vm1528_vm1 = vcmp.gt.f32.partialorder %v1450_v30, 0.0  ;;  %v1452_v52 = vadd.f32 %v1451_v29, %v1339_v9 }
 0x15c   : > { %v1342_v46 = vpop.f32.mrf.mxu0 }
 0x15d   : > { %v1455_v50 = vpop.f32.mrf.mxu1  ;;  %v1454_v55 = vadd.f32 %v1453_v48, %v1341_v34  ;;  %v1343_v53 = vadd.f32 %v1342_v46, %v1230_v36  ;;  %v1592_v4 = vsel %vm1528_vm1, %v1450_v30, %v1560_v44  ;;  %vm1529_vm3 = vcmp.gt.f32.partialorder %v1452_v52, 0.0 }
 0x15e   : > { %v1346_v57 = vpop.f32.mrf.mxu0  ;;  %v1561_v17 = vmul.f32 0.2, %v1452_v52 }
 0x15f   : > { %v1459_v61 = vpop.f32.mrf.mxu1  ;;  %vm1530_vm2 = vcmp.gt.f32.partialorder %v1454_v55, 0.0  ;;  %v1562_v59 = vmul.f32 0.2, %v1454_v55  ;;  %v1347_v2 = vadd.f32 %v1346_v57, %v3385_v5  ;;  %v1456_v63 = vadd.f32 %v1455_v50, %v1343_v53 }
 0x160   : > { %v1348_v15 = vpop.f32.mrf.mxu0 }
 0x161   : > { %v1461_v62 = vpop.f32.mrf.mxu1  ;;  %v1594_v22 = vsel %vm1530_vm2, %v1454_v55, %v1562_v59  ;;  %v1349_v23 = vadd.f32 %v1348_v15, %v3388_v10  ;;  %vm1531_vm4 = vcmp.gt.f32.partialorder %v1456_v63, 0.0  ;;  %v1563_v29 = vmul.f32 0.2, %v1456_v63 }
 0x162   : > { %v1624_v25 = vpack.c.bf16 %v1594_v22, %v1592_v4  ;;  %v1460_v9 = vadd.f32 %v1459_v61, %v1347_v2  ;;  %v1350_v32 = vpop.f32.mrf.mxu0  ;;  %v1593_v55 = vsel %vm1529_vm3, %v1452_v52, %v1561_v17  ;;  %v1137_v10 = vadd.f32 %v3404_v26, %v3369_v49 }
 0x163   : > { %v1463_v48 = vpop.f32.mrf.mxu1  ;;  %v1351_v34 = vadd.f32 %v1350_v32, %v3395_v14  ;;  %v1595_v36 = vsel %vm1531_vm4, %v1456_v63, %v1563_v29  ;;  %v1462_v44 = vadd.f32 %v1461_v62, %v1349_v23 }
 0x164   : > { %v1352_v5 = vpop.f32.mrf.mxu0  ;;  %v1564_v53 = vmul.f32 0.2, %v1460_v9  ;;  %v1625_v59 = vpack.c.bf16 %v1595_v36, %v1593_v55  ;;  %vm1532_vm6 = vcmp.gt.f32.partialorder %v1460_v9, 0.0  ;;  %v1250_v23 = vadd.f32 %v3406_v27, %v1137_v10 }
 0x165   : > { %v1465_v30 = vpop.f32.mrf.mxu1  ;;  %v1464_v46 = vadd.f32 %v1463_v48, %v1351_v34  ;;  %v1353_v50 = vadd.f32 %v1352_v5, %v1240_v12  ;;  %v1565_v63 = vmul.f32 0.2, %v1462_v44  ;;  %vm1533_vm8 = vcmp.gt.f32.partialorder %v1462_v44, 0.0 }
 0x166   : > { %v1356_v57 = vpop.f32.mrf.mxu0  ;;  %1876 = vmatprep.mubr.bf16.mxu0 %v1625_v59  ;;  %v1596_v29 = vsel %vm1532_vm6, %v1460_v9, %v1564_v53  ;;  %v1147_v36 = vadd.f32 %v3417_v39, %v3369_v49 }
 0x167   : > { %v1469_v61 = vpop.f32.mrf.mxu1  ;;  %vm1534_vm5 = vcmp.gt.f32.partialorder %v1464_v46, 0.0  ;;  %v1566_v2 = vmul.f32 0.2, %v1464_v46  ;;  %v1466_v13 = vadd.f32 %v1465_v30, %v1353_v50  ;;  %v1357_v14 = vadd.f32 %v1356_v57, %v3398_v20  ;;  %1877 = vmatmul.mubr.bf16.vlgmr.msra.gmra.mxu0 %v1624_v25 }
 0x168   : > { %v1358_v1 = vpop.f32.mrf.mxu0 }
 0x169   : > { %v1471_v4 = vpop.f32.mrf.mxu1  ;;  %vm1535_vm7 = vcmp.gt.f32.partialorder %v1466_v13, 0.0  ;;  %v1567_v15 = vmul.f32 0.2, %v1466_v13  ;;  %v1359_v52 = vadd.f32 %v1358_v1, %v3401_v24  ;;  %v1470_v26 = vadd.f32 %v1469_v61, %v1357_v14 }
 0x16a   : > { %v1360_v62 = vpop.f32.mrf.mxu0  ;;  %v1598_v22 = vsel %vm1534_vm5, %v1464_v46, %v1566_v2  ;;  %v1597_v24 = vsel %vm1533_vm8, %v1462_v44, %v1565_v63  ;;  %v1260_v1 = vadd.f32 %v3419_v40, %v1147_v36 }
 0x16b   : > { %v1473_v17 = vpop.f32.mrf.mxu1  ;;  %v1361_v20 = vadd.f32 %v1360_v62, %v3408_v28  ;;  %v1599_v12 = vsel %vm1535_vm7, %v1466_v13, %v1567_v15  ;;  %v1626_v34 = vpack.c.bf16 %v1598_v22, %v1596_v29  ;;  %v1472_v5 = vadd.f32 %v1471_v4, %v1359_v52 }
 0x16c   : > { %v1362_v32 = vpop.f32.mrf.mxu0  ;;  %v1568_v50 = vmul.f32 0.2, %v1470_v26  ;;  %v1627_v57 = vpack.c.bf16 %v1599_v12, %v1597_v24  ;;  %vm1536_vm10 = vcmp.gt.f32.partialorder %v1470_v26, 0.0 }
 0x16d   : > { %v1475_v48 = vpop.f32.mrf.mxu1  ;;  %v1474_v25 = vadd.f32 %v1473_v17, %v1361_v20  ;;  %v1363_v30 = vadd.f32 %v1362_v32, %v1250_v23  ;;  %v1569_v61 = vmul.f32 0.2, %v1472_v5  ;;  %vm1537_vm12 = vcmp.gt.f32.partialorder %v1472_v5, 0.0 }
 0x16e   : > { %v1366_v55 = vpop.f32.mrf.mxu0  ;;  %1886 = vmatprep.mubr.bf16.mxu0 %v1627_v57  ;;  %v1600_v4 = vsel %vm1536_vm10, %v1470_v26, %v1568_v50 }
 0x16f   : > { %v1479_v46 = vpop.f32.mrf.mxu1  ;;  %vm1538_vm9 = vcmp.gt.f32.partialorder %v1474_v25, 0.0  ;;  %v1570_v27 = vmul.f32 0.2, %v1474_v25  ;;  %v1476_v28 = vadd.f32 %v1475_v48, %v1363_v30  ;;  %v1367_v9 = vadd.f32 %v1366_v55, %v3411_v33  ;;  %1887 = vmatmul.mubr.bf16.gmra.mxu0 %v1626_v34 }
 0x170   : > { %v1368_v10 = vpop.f32.mrf.mxu0 }
 0x171   : > { %v1481_v53 = vpop.f32.mrf.mxu1  ;;  %vm1539_vm11 = vcmp.gt.f32.partialorder %v1476_v28, 0.0  ;;  %v1571_v59 = vmul.f32 0.2, %v1476_v28  ;;  %v1369_v44 = vadd.f32 %v1368_v10, %v3414_v37  ;;  %v1480_v39 = vadd.f32 %v1479_v46, %v1367_v9 }
 0x172   : > { %v1370_v2 = vpop.f32.mrf.mxu0  ;;  %v1602_v14 = vsel %vm1538_vm9, %v1474_v25, %v1570_v27  ;;  %v1601_v37 = vsel %vm1537_vm12, %v1472_v5, %v1569_v61 }
 0x173   : > { %v1483_v13 = vpop.f32.mrf.mxu1  ;;  %v1371_v33 = vadd.f32 %v1370_v2, %v3421_v41  ;;  %v1482_v63 = vadd.f32 %v1481_v53, %v1369_v44  ;;  %v1603_v62 = vsel %vm1539_vm11, %v1476_v28, %v1571_v59  ;;  %v1628_v17 = vpack.c.bf16 %v1602_v14, %v1600_v4 }
 0x174   : > { %v1372_v15 = vpop.f32.mrf.mxu0  ;;  %v1572_v20 = vmul.f32 0.2, %v1480_v39  ;;  %v1629_v48 = vpack.c.bf16 %v1603_v62, %v1601_v37  ;;  %v1157_v41 = vadd.f32 %v3430_v58, %v3369_v49  ;;  %vm1540_vm14 = vcmp.gt.f32.partialorder %v1480_v39, 0.0 }
 0x175   : > { %v1485_v52 = vpop.f32.mrf.mxu1  ;;  %v1484_v22 = vadd.f32 %v1483_v13, %v1371_v33  ;;  %v1373_v23 = vadd.f32 %v1372_v15, %v1260_v1  ;;  %v1573_v26 = vmul.f32 0.2, %v1482_v63  ;;  %vm1541_vm0 = vcmp.gt.f32.partialorder %v1482_v63, 0.0 }
 0x176   : > { %v1376_v29 = vpop.f32.mrf.mxu0  ;;  %1896 = vmatprep.mubr.bf16.mxu0 %v1629_v48  ;;  %v1604_v57 = vsel %vm1540_vm14, %v1480_v39, %v1572_v20  ;;  %v1270_v58 = vadd.f32 %v3432_v60, %v1157_v41  ;;  %v1167_v1 = vadd.f32 %v3443_v18, %v3369_v49 }
 0x177   : > { %v1489_v32 = vpop.f32.mrf.mxu1  ;;  %vm1542_vm13 = vcmp.gt.f32.partialorder %v1484_v22, 0.0  ;;  %v1574_v12 = vmul.f32 0.2, %v1484_v22  ;;  %v1486_v34 = vadd.f32 %v1485_v52, %v1373_v23  ;;  %v1377_v40 = vadd.f32 %v1376_v29, %v3424_v51  ;;  %1897 = vmatmul.mubr.bf16.gmra.mxu0 %v1628_v17 }
 0x178   : > { %v1378_v25 = vpop.f32.mrf.mxu0  ;;  %v1605_v44 = vsel %vm1541_vm0, %v1482_v63, %v1573_v26  ;;  %v1280_v20 = vadd.f32 %v3445_v19, %v1167_v1 }
 0x179   : > { %v1491_v30 = vpop.f32.mrf.mxu1  ;;  %vm1543_vm15 = vcmp.gt.f32.partialorder %v1486_v34, 0.0  ;;  %v1575_v24 = vmul.f32 0.2, %v1486_v34  ;;  %v1490_v5 = vadd.f32 %v1489_v32, %v1377_v40  ;;  %v1379_v36 = vadd.f32 %v1378_v25, %v3427_v56 }
 0x17a   : > { %v1380_v50 = vpop.f32.mrf.mxu0  ;;  %v1606_v46 = vsel %vm1542_vm13, %v1484_v22, %v1574_v12 }
 0x17b   : > { %v1493_v55 = vpop.f32.mrf.mxu1  ;;  %v1381_v51 = vadd.f32 %v1380_v50, %v3434_v0  ;;  %v1576_v27 = vmul.f32 0.2, %v1490_v5  ;;  %v1607_v10 = vsel %vm1543_vm15, %v1486_v34, %v1575_v24  ;;  %v1630_v53 = vpack.c.bf16 %v1606_v46, %v1604_v57 }
 0x17c   : > { %v1382_v28 = vpop.f32.mrf.mxu0  ;;  %vm1544_vm1 = vcmp.gt.f32.partialorder %v1490_v5, 0.0  ;;  %v1492_v61 = vadd.f32 %v1491_v30, %v1379_v36  ;;  %v1631_v14 = vpack.c.bf16 %v1607_v10, %v1605_v44 }
 0x17d   : > { %v1495_v9 = vpop.f32.mrf.mxu1  ;;  %v1494_v59 = vadd.f32 %v1493_v55, %v1381_v51  ;;  %v1383_v56 = vadd.f32 %v1382_v28, %v1270_v58  ;;  %v1608_v39 = vsel %vm1544_vm1, %v1490_v5, %v1576_v27 }
 0x17e   : > { %v1386_v2 = vpop.f32.mrf.mxu0  ;;  %1906 = vmatprep.mubr.bf16.mxu0 %v1631_v14  ;;  %vm1545_vm3 = vcmp.gt.f32.partialorder %v1492_v61, 0.0  ;;  %v1577_v52 = vmul.f32 0.2, %v1492_v61 }
 0x17f   : > { %v1499_v13 = vpop.f32.mrf.mxu1  ;;  %vm1546_vm2 = vcmp.gt.f32.partialorder %v1494_v59, 0.0  ;;  %v1578_v0 = vmul.f32 0.2, %v1494_v59  ;;  %v1387_v60 = vadd.f32 %v1386_v2, %v3437_v7  ;;  %v1496_v33 = vadd.f32 %v1495_v9, %v1383_v56  ;;  %1907 = vmatmul.mubr.bf16.gmra.mxu0 %v1630_v53 }
 0x180   : > { %v1388_v4 = vpop.f32.mrf.mxu0  ;;  %v1609_v41 = vsel %vm1545_vm3, %v1492_v61, %v1577_v52 }
 0x181   : > { %v1501_v15 = vpop.f32.mrf.mxu1  ;;  %v1610_v62 = vsel %vm1546_vm2, %v1494_v59, %v1578_v0  ;;  %v1389_v63 = vadd.f32 %v1388_v4, %v3440_v16  ;;  %vm1547_vm4 = vcmp.gt.f32.partialorder %v1496_v33, 0.0  ;;  %v1579_v22 = vmul.f32 0.2, %v1496_v33 }
 0x182   : > { %v1632_v17 = vpack.c.bf16 %v1610_v62, %v1608_v39  ;;  %v1500_v23 = vadd.f32 %v1499_v13, %v1387_v60  ;;  %v1390_v18 = vpop.f32.mrf.mxu0  ;;  %v1177_v16 = vadd.f32 %v3456_v38, %v3369_v49  ;;  %v1187_v13 = vadd.f32 %v3469_v6, %v3369_v49 }
 0x183   : > { %v1503_v37 = vpop.f32.mrf.mxu1  ;;  %v1391_v7 = vadd.f32 %v1390_v18, %v3447_v21  ;;  %v1611_v48 = vsel %vm1547_vm4, %v1496_v33, %v1579_v22  ;;  %v1502_v12 = vadd.f32 %v1501_v15, %v1389_v63 }
 0x184   : > { %v1392_v29 = vpop.f32.mrf.mxu0  ;;  %v1580_v26 = vmul.f32 0.2, %v1500_v23  ;;  %v1633_v24 = vpack.c.bf16 %v1611_v48, %v1609_v41  ;;  %vm1548_vm6 = vcmp.gt.f32.partialorder %v1500_v23, 0.0  ;;  %v1290_v28 = vadd.f32 %v3458_v42, %v1177_v16 }
 0x185   : > { %v1505_v32 = vpop.f32.mrf.mxu1  ;;  %v1504_v34 = vadd.f32 %v1503_v37, %v1391_v7  ;;  %v1393_v40 = vadd.f32 %v1392_v29, %v1280_v20  ;;  %v1581_v55 = vmul.f32 0.2, %v1502_v12  ;;  %vm1549_vm8 = vcmp.gt.f32.partialorder %v1502_v12, 0.0 }
 0x186   : > { %v1396_v25 = vpop.f32.mrf.mxu0  ;;  %1916 = vmatprep.mubr.bf16.mxu1 %v1633_v24  ;;  %v1612_v9 = vsel %vm1548_vm6, %v1500_v23, %v1580_v26  ;;  %v1300_v22 = vadd.f32 %v3471_v8, %v1187_v13 }
 0x187   : > { %v1509_v30 = vpop.f32.mrf.mxu1  ;;  %vm1550_vm5 = vcmp.gt.f32.partialorder %v1504_v34, 0.0  ;;  %v1582_v5 = vmul.f32 0.2, %v1504_v34  ;;  %v1506_v19 = vadd.f32 %v1505_v32, %v1393_v40  ;;  %v1397_v21 = vadd.f32 %v1396_v25, %v3450_v31  ;;  %1917 = vmatmul.mubr.bf16.vlgmr.msra.gmra.mxu1 %v1632_v17 }
 0x188   : > { %v1398_v36 = vpop.f32.mrf.mxu0 }
 0x189   : > { %v1511_v50 = vpop.f32.mrf.mxu1  ;;  %vm1551_vm7 = vcmp.gt.f32.partialorder %v1506_v19, 0.0  ;;  %v1583_v46 = vmul.f32 0.2, %v1506_v19  ;;  %v1399_v51 = vadd.f32 %v1398_v36, %v3453_v35  ;;  %v1510_v38 = vadd.f32 %v1509_v30, %v1397_v21 }
 0x18a   : > { %v1400_v57 = vpop.f32.mrf.mxu0  ;;  %v1614_v27 = vsel %vm1550_vm5, %v1504_v34, %v1582_v5  ;;  %v1613_v35 = vsel %vm1549_vm8, %v1502_v12, %v1581_v55 }
 0x18b   : > { %v1513_v58 = vpop.f32.mrf.mxu1  ;;  %v1401_v31 = vadd.f32 %v1400_v57, %v3460_v43  ;;  %v1512_v10 = vadd.f32 %v1511_v50, %v1399_v51  ;;  %v1615_v59 = vsel %vm1551_vm7, %v1506_v19, %v1583_v46  ;;  %v1634_v44 = vpack.c.bf16 %v1614_v27, %v1612_v9  ;;  %v1672_v19 = vld [vmem:[%s3660_s4] sm:$0x3] }
 0x18c   : > { %v1402_v53 = vpop.f32.mrf.mxu0  ;;  %v1584_v14 = vmul.f32 0.2, %v1510_v38  ;;  %v1635_v60 = vpack.c.bf16 %v1615_v59, %v1613_v35  ;;  %vm1552_vm10 = vcmp.gt.f32.partialorder %v1510_v38, 0.0  ;;  %v3538_v21 = vrot.slane %v1672_v19, %v3358_v45  ;;  %v2053_v46 = vld [vmem:[%s3661_s5] sm:$0x3] }
 0x18d   : > { %v1515_v61 = vpop.f32.mrf.mxu1  ;;  %v1514_v56 = vadd.f32 %v1513_v58, %v1401_v31  ;;  %v1403_v2 = vadd.f32 %v1402_v53, %v1290_v28  ;;  %v1585_v33 = vmul.f32 0.2, %v1512_v10  ;;  %vm1553_vm12 = vcmp.gt.f32.partialorder %v1512_v10, 0.0 }
 0x18e   : > { %v1406_v1 = vpop.f32.mrf.mxu0  ;;  %1926 = vmatprep.mubr.bf16.mxu1 %v1635_v60  ;;  %v1616_v18 = vsel %vm1552_vm10, %v1510_v38, %v1584_v14  ;;  %v3541_v36 = vrot.slane %v1672_v19, %v3363_v47  ;;  %v3549_v27 = vrot.slane %v2053_v46, %v3358_v45  ;;  %v3552_v28 = vrot.slane %v2053_v46, %v3363_v47 }
 0x18f   : > { %v1519_v0 = vpop.f32.mrf.mxu1  ;;  %vm1554_vm9 = vcmp.gt.f32.partialorder %v1514_v56, 0.0  ;;  %v1586_v42 = vmul.f32 0.2, %v1514_v56  ;;  %v1516_v43 = vadd.f32 %v1515_v61, %v1403_v2  ;;  %v1407_v39 = vadd.f32 %v1406_v1, %v3463_v54  ;;  %1927 = vmatmul.mubr.bf16.gmra.mxu1 %v1634_v44 }
 0x190   : > { %v1408_v4 = vpop.f32.mrf.mxu0  ;;  %v1617_v12 = vsel %vm1553_vm12, %v1512_v10, %v1585_v33 }
 0x191   : > { %v1521_v15 = vpop.f32.mrf.mxu1  ;;  %vm1555_vm11 = vcmp.gt.f32.partialorder %v1516_v43, 0.0  ;;  %v1587_v52 = vmul.f32 0.2, %v1516_v43  ;;  %v1520_v62 = vadd.f32 %v1519_v0, %v1407_v39  ;;  %v1409_v49 = vadd.f32 %v1408_v4, %v3466_v3 }
 0x192   : > { %v1410_v6 = vpop.f32.mrf.mxu0  ;;  %v1618_v17 = vsel %vm1554_vm9, %v1514_v56, %v1586_v42 }
 0x193   : > { %v1523_v63 = vpop.f32.mrf.mxu1  ;;  %v1522_v23 = vadd.f32 %v1521_v15, %v1409_v49  ;;  %v1411_v54 = vadd.f32 %v1410_v6, %v3473_v11  ;;  %v1619_v20 = vsel %vm1555_vm11, %v1516_v43, %v1587_v52  ;;  %v1636_v7 = vpack.c.bf16 %v1618_v17, %v1616_v18 }
 0x194   : > { %v1412_v37 = vpop.f32.mrf.mxu0  ;;  %v1588_v29 = vmul.f32 0.2, %v1520_v62  ;;  %vm1556_vm13 = vcmp.gt.f32.partialorder %v1520_v62, 0.0  ;;  %v1637_v34 = vpack.c.bf16 %v1619_v20, %v1617_v12 }
 0x195   : > { %v1524_v32 = vadd.f32 %v1523_v63, %v1411_v54  ;;  %v1413_v48 = vadd.f32 %v1412_v37, %v1300_v22  ;;  %v1525_v3 = vpop.f32.mrf.mxu1  ;;  %v1589_v40 = vmul.f32 0.2, %v1522_v23  ;;  %vm1557_vm15 = vcmp.gt.f32.partialorder %v1522_v23, 0.0 }
 0x196   : > { %1936 = vmatprep.mubr.bf16.mxu1 %v1637_v34  ;;  %v1620_v11 = vsel %vm1556_vm13, %v1520_v62, %v1588_v29 }
 0x197   : > { %vm1558_vm14 = vcmp.gt.f32.partialorder %v1524_v32, 0.0  ;;  %v1590_v41 = vmul.f32 0.2, %v1524_v32  ;;  %v1526_v16 = vadd.f32 %v1525_v3, %v1413_v48  ;;  %1937 = vmatmul.mubr.bf16.gmra.mxu1 %v1636_v7  ;;  %v1621_v30 = vsel %vm1557_vm15, %v1522_v23, %v1589_v40 }
 0x199   : > { %vm1559_vm0 = vcmp.gt.f32.partialorder %v1526_v16, 0.0  ;;  %v1591_v8 = vmul.f32 0.2, %v1526_v16  ;;  %v1622_v26 = vsel %vm1558_vm14, %v1524_v32, %v1590_v41 }
 0x19a   : > { %v1638_v25 = vpack.c.bf16 %v1622_v26, %v1620_v11 }
 0x19b   : > { %v1623_v24 = vsel %vm1559_vm0, %v1526_v16, %v1591_v8 }
 0x19c   : > { %v1639_v5 = vpack.c.bf16 %v1623_v24, %v1621_v30 }
 0x19e   : > { %1946 = vmatprep.mubr.bf16.mxu1 %v1639_v5 }
 0x19f   : > { %1947 = vmatmul.mubr.bf16.gmra.mxu1 %v1638_v25 }
 0x227   : > { %v1878_v50 = vpop.f32.mrf.mxu0 }
 0x228   : > { %v1879_v55 = vadd.f32 %v1878_v50, %v3538_v21 }
 0x229   : > { %v1880_v51 = vpop.f32.mrf.mxu0 }
 0x22a   : > { %vm1957_vm1 = vcmp.gt.f32.partialorder %v1879_v55, 0.0  ;;  %v1989_v38 = vmul.f32 0.2, %v1879_v55  ;;  %v1881_v57 = vadd.f32 %v1880_v51, %v3541_v36 }
 0x22b   : > { %v1882_v58 = vpop.f32.mrf.mxu0 }
 0x22c   : > { %vm1958_vm2 = vcmp.gt.f32.partialorder %v1881_v57, 0.0  ;;  %v1990_v31 = vmul.f32 0.2, %v1881_v57  ;;  %v1883_v9 = vadd.f32 %v1882_v58, %v3538_v21  ;;  %v2021_v10 = vsel %vm1957_vm1, %v1879_v55, %v1989_v38 }
 0x22d   : > { %v1884_v53 = vpop.f32.mrf.mxu0  ;;  %v2065_v2 = vmul.f32 %v3549_v27, %v2021_v10 }
 0x22e   : > { %vm1959_vm3 = vcmp.gt.f32.partialorder %v1883_v9, 0.0  ;;  %v1991_v61 = vmul.f32 0.2, %v1883_v9  ;;  %v1885_v59 = vadd.f32 %v1884_v53, %v3541_v36  ;;  %v2022_v44 = vsel %vm1958_vm2, %v1881_v57, %v1990_v31 }
 0x22f   : > { %v1888_v56 = vpop.f32.mrf.mxu0  ;;  %v2066_v45 = vmul.f32 %v3552_v28, %v2022_v44 }
 0x230   : > { %vm1960_vm4 = vcmp.gt.f32.partialorder %v1885_v59, 0.0  ;;  %v1992_v35 = vmul.f32 0.2, %v1885_v59  ;;  %v1889_v47 = vadd.f32 %v1888_v56, %v3538_v21  ;;  %v2023_v13 = vsel %vm1959_vm3, %v1883_v9, %v1991_v61 }
 0x231   : > { %v1890_v14 = vpop.f32.mrf.mxu0  ;;  %v2097_v1 = vadd.f32 %v2066_v45, %v2065_v2  ;;  %v2067_v39 = vmul.f32 %v3549_v27, %v2023_v13 }
 0x232   : > { %vm1961_vm5 = vcmp.gt.f32.partialorder %v1889_v47, 0.0  ;;  %v1993_v0 = vmul.f32 0.2, %v1889_v47  ;;  %v1891_v60 = vadd.f32 %v1890_v14, %v3541_v36  ;;  %v2024_v42 = vsel %vm1960_vm4, %v1885_v59, %v1992_v35 }
 0x233   : > { %v1892_v43 = vpop.f32.mrf.mxu0  ;;  %2098 = vadd.xlane.f32.xlu0 %v2097_v1  ;;  %v2068_v33 = vmul.f32 %v3552_v28, %v2024_v42 }
 0x234   : > { %vm1962_vm6 = vcmp.gt.f32.partialorder %v1891_v60, 0.0  ;;  %v1994_v4 = vmul.f32 0.2, %v1891_v60  ;;  %v1893_v15 = vadd.f32 %v1892_v43, %v3538_v21  ;;  %v2025_v52 = vsel %vm1961_vm5, %v1889_v47, %v1993_v0 }
 0x235   : > { %v1894_v62 = vpop.f32.mrf.mxu0  ;;  %v2100_v49 = vadd.f32 %v2068_v33, %v2067_v39  ;;  %v2069_v23 = vmul.f32 %v3549_v27, %v2025_v52 }
 0x236   : > { %vm1963_vm7 = vcmp.gt.f32.partialorder %v1893_v15, 0.0  ;;  %v1995_v6 = vmul.f32 0.2, %v1893_v15  ;;  %v1895_v63 = vadd.f32 %v1894_v62, %v3541_v36  ;;  %v2026_v17 = vsel %vm1962_vm6, %v1891_v60, %v1994_v4 }
 0x237   : > { %v1898_v22 = vpop.f32.mrf.mxu0  ;;  %2101 = vadd.xlane.f32.xlu0 %v2100_v49  ;;  %v2070_v54 = vmul.f32 %v3552_v28, %v2026_v17 }
 0x238   : > { %vm1964_vm8 = vcmp.gt.f32.partialorder %v1895_v63, 0.0  ;;  %v1996_v18 = vmul.f32 0.2, %v1895_v63  ;;  %v1899_v37 = vadd.f32 %v1898_v22, %v3538_v21  ;;  %v2027_v20 = vsel %vm1963_vm7, %v1893_v15, %v1995_v6 }
 0x239   : > { %v1900_v7 = vpop.f32.mrf.mxu0  ;;  %v2103_v29 = vadd.f32 %v2070_v54, %v2069_v23  ;;  %v2071_v34 = vmul.f32 %v3549_v27, %v2027_v20 }
 0x23a   : > { %vm1965_vm9 = vcmp.gt.f32.partialorder %v1899_v37, 0.0  ;;  %v1997_v32 = vmul.f32 0.2, %v1899_v37  ;;  %v1901_v48 = vadd.f32 %v1900_v7, %v3541_v36  ;;  %v2028_v12 = vsel %vm1964_vm8, %v1895_v63, %v1996_v18 }
 0x23b   : > { %v1902_v3 = vpop.f32.mrf.mxu0  ;;  %2104 = vadd.xlane.f32.xlu1 %v2103_v29  ;;  %v2072_v40 = vmul.f32 %v3552_v28, %v2028_v12 }
 0x23c   : > { %vm1966_vm10 = vcmp.gt.f32.partialorder %v1901_v48, 0.0  ;;  %v1998_v41 = vmul.f32 0.2, %v1901_v48  ;;  %v1903_v16 = vadd.f32 %v1902_v3, %v3538_v21  ;;  %v2029_v8 = vsel %vm1965_vm9, %v1899_v37, %v1997_v32 }
 0x23d   : > { %v1904_v11 = vpop.f32.mrf.mxu0  ;;  %v2106_v26 = vadd.f32 %v2072_v40, %v2071_v34  ;;  %v2073_v19 = vmul.f32 %v3549_v27, %v2029_v8 }
 0x23e   : > { %vm1967_vm11 = vcmp.gt.f32.partialorder %v1903_v16, 0.0  ;;  %v1999_v25 = vmul.f32 0.2, %v1903_v16  ;;  %v1905_v30 = vadd.f32 %v1904_v11, %v3541_v36  ;;  %v2030_v24 = vsel %vm1966_vm10, %v1901_v48, %v1998_v41 }
 0x23f   : > { %v1908_v5 = vpop.f32.mrf.mxu0  ;;  %2107 = vadd.xlane.f32.xlu1 %v2106_v26  ;;  %v2074_v50 = vmul.f32 %v3552_v28, %v2030_v24 }
 0x240   : > { %vm1968_vm12 = vcmp.gt.f32.partialorder %v1905_v30, 0.0  ;;  %v2000_v55 = vmul.f32 0.2, %v1905_v30  ;;  %v1909_v46 = vadd.f32 %v1908_v5, %v3538_v21  ;;  %v2031_v51 = vsel %vm1967_vm11, %v1903_v16, %v1999_v25 }
 0x241   : > { %v1910_v38 = vpop.f32.mrf.mxu0  ;;  %v2109_v57 = vadd.f32 %v2074_v50, %v2073_v19  ;;  %v2075_v53 = vmul.f32 %v3549_v27, %v2031_v51 }
 0x242   : > { %vm1969_vm13 = vcmp.gt.f32.partialorder %v1909_v46, 0.0  ;;  %v2001_v58 = vmul.f32 0.2, %v1909_v46  ;;  %v1911_v31 = vadd.f32 %v1910_v38, %v3541_v36  ;;  %v2032_v9 = vsel %vm1968_vm12, %v1905_v30, %v2000_v55 }
 0x243   : > { %v1912_v10 = vpop.f32.mrf.mxu0  ;;  %2110 = vadd.xlane.f32.xlu0 %v2109_v57  ;;  %v2076_v61 = vmul.f32 %v3552_v28, %v2032_v9 }
 0x244   : > { %vm1970_vm14 = vcmp.gt.f32.partialorder %v1911_v31, 0.0  ;;  %v2002_v59 = vmul.f32 0.2, %v1911_v31  ;;  %v1913_v44 = vadd.f32 %v1912_v10, %v3538_v21  ;;  %v2033_v56 = vsel %vm1969_vm13, %v1909_v46, %v2001_v58 }
 0x245   : > { %v1914_v2 = vpop.f32.mrf.mxu0  ;;  %v2112_v45 = vadd.f32 %v2076_v61, %v2075_v53  ;;  %v2077_v1 = vmul.f32 %v3549_v27, %v2033_v56 }
 0x246   : > { %vm1971_vm15 = vcmp.gt.f32.partialorder %v1913_v44, 0.0  ;;  %v2003_v35 = vmul.f32 0.2, %v1913_v44  ;;  %v1915_v47 = vadd.f32 %v1914_v2, %v3541_v36  ;;  %v2034_v13 = vsel %vm1970_vm14, %v1911_v31, %v2002_v59 }
 0x247   : > { %v1918_v14 = vpop.f32.mrf.mxu1  ;;  %2113 = vadd.xlane.f32.xlu1 %v2112_v45  ;;  %v2078_v0 = vmul.f32 %v3552_v28, %v2034_v13 }
 0x248   : > { %vm1972_vm0 = vcmp.gt.f32.partialorder %v1915_v47, 0.0  ;;  %v2004_v60 = vmul.f32 0.2, %v1915_v47  ;;  %v1919_v42 = vadd.f32 %v1918_v14, %v3538_v21  ;;  %v2035_v43 = vsel %vm1971_vm15, %v1913_v44, %v2003_v35 }
 0x249   : > { %v1920_v39 = vpop.f32.mrf.mxu1  ;;  %v2115_v33 = vadd.f32 %v2078_v0, %v2077_v1  ;;  %v2079_v49 = vmul.f32 %v3549_v27, %v2035_v43 }
 0x24a   : > { %vm1973_vm1 = vcmp.gt.f32.partialorder %v1919_v42, 0.0  ;;  %v2005_v4 = vmul.f32 0.2, %v1919_v42  ;;  %v1921_v15 = vadd.f32 %v1920_v39, %v3541_v36  ;;  %v2036_v52 = vsel %vm1972_vm0, %v1915_v47, %v2004_v60 }
 0x24b   : > { %v1922_v62 = vpop.f32.mrf.mxu1  ;;  %2116 = vadd.xlane.f32.xlu0 %v2115_v33  ;;  %v2080_v6 = vmul.f32 %v3552_v28, %v2036_v52 }
 0x24c   : > { %vm1974_vm2 = vcmp.gt.f32.partialorder %v1921_v15, 0.0  ;;  %v2006_v63 = vmul.f32 0.2, %v1921_v15  ;;  %v1923_v17 = vadd.f32 %v1922_v62, %v3538_v21  ;;  %v2037_v22 = vsel %vm1973_vm1, %v1919_v42, %v2005_v4 }
 0x24d   : > { %v1924_v23 = vpop.f32.mrf.mxu1  ;;  %v2118_v54 = vadd.f32 %v2080_v6, %v2079_v49  ;;  %v2081_v29 = vmul.f32 %v3549_v27, %v2037_v22 }
 0x24e   : > { %vm1975_vm3 = vcmp.gt.f32.partialorder %v1923_v17, 0.0  ;;  %v2007_v18 = vmul.f32 0.2, %v1923_v17  ;;  %v1925_v37 = vadd.f32 %v1924_v23, %v3541_v36  ;;  %v2038_v20 = vsel %vm1974_vm2, %v1921_v15, %v2006_v63 }
 0x24f   : > { %v1928_v7 = vpop.f32.mrf.mxu1  ;;  %2119 = vadd.xlane.f32.xlu1 %v2118_v54  ;;  %v2082_v32 = vmul.f32 %v3552_v28, %v2038_v20 }
 0x250   : > { %vm1976_vm4 = vcmp.gt.f32.partialorder %v1925_v37, 0.0  ;;  %v2008_v48 = vmul.f32 0.2, %v1925_v37  ;;  %v1929_v12 = vadd.f32 %v1928_v7, %v3538_v21  ;;  %v2039_v3 = vsel %vm1975_vm3, %v1923_v17, %v2007_v18 }
 0x251   : > { %v1930_v34 = vpop.f32.mrf.mxu1  ;;  %v2121_v40 = vadd.f32 %v2082_v32, %v2081_v29  ;;  %v2083_v26 = vmul.f32 %v3549_v27, %v2039_v3 }
 0x252   : > { %vm1977_vm5 = vcmp.gt.f32.partialorder %v1929_v12, 0.0  ;;  %v2009_v41 = vmul.f32 0.2, %v1929_v12  ;;  %v1931_v16 = vadd.f32 %v1930_v34, %v3541_v36  ;;  %v2040_v8 = vsel %vm1976_vm4, %v1925_v37, %v2008_v48 }
 0x253   : > { %v1932_v11 = vpop.f32.mrf.mxu1  ;;  %2122 = vadd.xlane.f32.xlu0 %v2121_v40  ;;  %v2084_v25 = vmul.f32 %v3552_v28, %v2040_v8 }
 0x254   : > { %vm1978_vm6 = vcmp.gt.f32.partialorder %v1931_v16, 0.0  ;;  %v2010_v30 = vmul.f32 0.2, %v1931_v16  ;;  %v1933_v24 = vadd.f32 %v1932_v11, %v3538_v21  ;;  %v2041_v5 = vsel %vm1977_vm5, %v1929_v12, %v2009_v41 }
 0x255   : > { %v1934_v19 = vpop.f32.mrf.mxu1  ;;  %v2124_v50 = vadd.f32 %v2084_v25, %v2083_v26  ;;  %v2085_v57 = vmul.f32 %v3549_v27, %v2041_v5 }
 0x256   : > { %vm1979_vm7 = vcmp.gt.f32.partialorder %v1933_v24, 0.0  ;;  %v2011_v55 = vmul.f32 0.2, %v1933_v24  ;;  %v1935_v46 = vadd.f32 %v1934_v19, %v3541_v36  ;;  %v2042_v51 = vsel %vm1978_vm6, %v1931_v16, %v2010_v30 }
 0x257   : > { %v1938_v38 = vpop.f32.mrf.mxu1  ;;  %2125 = vadd.xlane.f32.xlu1 %v2124_v50  ;;  %v2086_v58 = vmul.f32 %v3552_v28, %v2042_v51 }
 0x258   : > { %vm1980_vm8 = vcmp.gt.f32.partialorder %v1935_v46, 0.0  ;;  %v2012_v31 = vmul.f32 0.2, %v1935_v46  ;;  %v1939_v9 = vadd.f32 %v1938_v38, %v3538_v21  ;;  %v2043_v10 = vsel %vm1979_vm7, %v1933_v24, %v2011_v55 }
 0x259   : > { %v1940_v53 = vpop.f32.mrf.mxu1  ;;  %v2127_v61 = vadd.f32 %v2086_v58, %v2085_v57  ;;  %v2087_v45 = vmul.f32 %v3549_v27, %v2043_v10  ;;  %v2178_v10 = vstv %s2177_s25 }
 0x25a   : > { %vm1981_vm9 = vcmp.gt.f32.partialorder %v1939_v9, 0.0  ;;  %v2013_v59 = vmul.f32 0.2, %v1939_v9  ;;  %v1941_v44 = vadd.f32 %v1940_v53, %v3541_v36  ;;  %v2044_v56 = vsel %vm1980_vm8, %v1935_v46, %v2012_v31 }
 0x25b   : > { %v1942_v2 = vpop.f32.mrf.mxu1  ;;  %2128 = vadd.xlane.f32.xlu0 %v2127_v61  ;;  %v2088_v35 = vmul.f32 %v3552_v28, %v2044_v56 }
 0x25c   : > { %vm1982_vm10 = vcmp.gt.f32.partialorder %v1941_v44, 0.0  ;;  %v2014_v47 = vmul.f32 0.2, %v1941_v44  ;;  %v1943_v13 = vadd.f32 %v1942_v2, %v3538_v21  ;;  %v2045_v14 = vsel %vm1981_vm9, %v1939_v9, %v2013_v59 }
 0x25d   : > { %v1944_v1 = vpop.f32.mrf.mxu1  ;;  %v2130_v0 = vadd.f32 %v2088_v35, %v2087_v45  ;;  %v2089_v33 = vmul.f32 %v3549_v27, %v2045_v14 }
 0x25e   : > { %vm1983_vm11 = vcmp.gt.f32.partialorder %v1943_v13, 0.0  ;;  %v2015_v60 = vmul.f32 0.2, %v1943_v13  ;;  %v1945_v42 = vadd.f32 %v1944_v1, %v3541_v36  ;;  %v2046_v43 = vsel %vm1982_vm10, %v1941_v44, %v2014_v47 }
 0x25f   : > { %v1948_v39 = vpop.f32.mrf.mxu1  ;;  %2131 = vadd.xlane.f32.xlu1 %v2130_v0  ;;  %v2090_v4 = vmul.f32 %v3552_v28, %v2046_v43 }
 0x260   : > { %vm1984_vm12 = vcmp.gt.f32.partialorder %v1945_v42, 0.0  ;;  %v2016_v15 = vmul.f32 0.2, %v1945_v42  ;;  %v1949_v52 = vadd.f32 %v1948_v39, %v3538_v21  ;;  %v2047_v62 = vsel %vm1983_vm11, %v1943_v13, %v2015_v60 }
 0x261   : > { %v1950_v49 = vpop.f32.mrf.mxu1  ;;  %v2133_v6 = vadd.f32 %v2090_v4, %v2089_v33  ;;  %v2091_v54 = vmul.f32 %v3549_v27, %v2047_v62 }
 0x262   : > { %vm1985_vm13 = vcmp.gt.f32.partialorder %v1949_v52, 0.0  ;;  %v2017_v63 = vmul.f32 0.2, %v1949_v52  ;;  %v1951_v17 = vadd.f32 %v1950_v49, %v3541_v36  ;;  %v2048_v22 = vsel %vm1984_vm12, %v1945_v42, %v2016_v15 }
 0x263   : > { %v1952_v23 = vpop.f32.mrf.mxu1  ;;  %2134 = vadd.xlane.f32.xlu0 %v2133_v6  ;;  %v2092_v18 = vmul.f32 %v3552_v28, %v2048_v22 }
 0x264   : > { %vm1986_vm14 = vcmp.gt.f32.partialorder %v1951_v17, 0.0  ;;  %v2018_v37 = vmul.f32 0.2, %v1951_v17  ;;  %v1953_v20 = vadd.f32 %v1952_v23, %v3538_v21  ;;  %v2049_v7 = vsel %vm1985_vm13, %v1949_v52, %v2017_v63 }
 0x265   : > { %v1954_v29 = vpop.f32.mrf.mxu1  ;;  %v2136_v32 = vadd.f32 %v2092_v18, %v2091_v54  ;;  %v2093_v34 = vmul.f32 %v3549_v27, %v2049_v7 }
 0x266   : > { %vm1987_vm15 = vcmp.gt.f32.partialorder %v1953_v20, 0.0  ;;  %v2019_v48 = vmul.f32 0.2, %v1953_v20  ;;  %v1955_v12 = vadd.f32 %v1954_v29, %v3541_v36  ;;  %v2050_v3 = vsel %vm1986_vm14, %v1951_v17, %v2018_v37 }
 0x267   : > { %2137 = vadd.xlane.f32.xlu1 %v2136_v32  ;;  %v2094_v40 = vmul.f32 %v3552_v28, %v2050_v3 }
 0x268   : > { %vm1988_vm0 = vcmp.gt.f32.partialorder %v1955_v12, 0.0  ;;  %v2020_v41 = vmul.f32 0.2, %v1955_v12  ;;  %v2051_v16 = vsel %vm1987_vm15, %v1953_v20, %v2019_v48 }
 0x269   : > { %v2139_v8 = vadd.f32 %v2094_v40, %v2093_v34  ;;  %v2095_v21 = vmul.f32 %v3549_v27, %v2051_v16 }
 0x26a   : > { %v2052_v11 = vsel %vm1988_vm0, %v1955_v12, %v2020_v41 }
 0x26b   : > { %2140 = vadd.xlane.f32.xlu0 %v2139_v8  ;;  %v2096_v26 = vmul.f32 %v3552_v28, %v2052_v11 }
 0x26d   : > { %v2142_v25 = vadd.f32 %v2096_v26, %v2095_v21 }
 0x26f   : > { %2143 = vadd.xlane.f32.xlu1 %v2142_v25 }
 0x2bc   : > { %v2099_v30 = vpop.xlane.xlu0 %2098 }
 0x2bd   : > { %2145 = vxpose.xlu0.b32.start [1/16] (narrow) %v2099_v30, 8 }
 0x2c0   : > { %v2102_v36 = vpop.xlane.xlu0 %2101 }
 0x2c1   : > { %2146 = vxpose.xlu0.b32.cont [2/16] (narrow) %v2102_v36, 8 }
 0x2c4   : > { %v2105_v24 = vpop.xlane.xlu1 %2104 }
 0x2c5   : > { %2147 = vxpose.xlu0.b32.cont [3/16] (narrow) %v2105_v24, 8 }
 0x2c8   : > { %v2108_v5 = vpop.xlane.xlu1 %2107 }
 0x2c9   : > { %2148 = vxpose.xlu0.b32.cont [4/16] (narrow) %v2108_v5, 8 }
 0x2cc   : > { %v2111_v19 = vpop.xlane.xlu0 %2110 }
 0x2cd   : > { %2149 = vxpose.xlu0.b32.cont [5/16] (narrow) %v2111_v19, 8 }
 0x2d0   : > { %v2114_v50 = vpop.xlane.xlu1 %2113 }
 0x2d1   : > { %2150 = vxpose.xlu0.b32.cont [6/16] (narrow) %v2114_v50, 8 }
 0x2d4   : > { %v2117_v55 = vpop.xlane.xlu0 %2116 }
 0x2d5   : > { %2151 = vxpose.xlu0.b32.cont [7/16] (narrow) %v2117_v55, 8 }
 0x2d8   : > { %v2120_v46 = vpop.xlane.xlu1 %2119 }
 0x2d9   : > { %2152 = vxpose.xlu0.b32.cont [8/16] (narrow) %v2120_v46, 8 }
 0x2dc   : > { %v2123_v27 = vpop.xlane.xlu0 %2122 }
 0x2dd   : > { %2153 = vxpose.xlu0.b32.cont [9/16] (narrow) %v2123_v27, 8 }
 0x2e0   : > { %v2126_v28 = vpop.xlane.xlu1 %2125 }
 0x2e1   : > { %2154 = vxpose.xlu0.b32.cont [10/16] (narrow) %v2126_v28, 8 }
 0x2e4   : > { %v2129_v51 = vpop.xlane.xlu0 %2128 }
 0x2e5   : > { %2155 = vxpose.xlu0.b32.cont [11/16] (narrow) %v2129_v51, 8 }
 0x2e8   : > { %v2132_v38 = vpop.xlane.xlu1 %2131 }
 0x2e9   : > { %2156 = vxpose.xlu0.b32.cont [12/16] (narrow) %v2132_v38, 8 }
 0x2ec   : > { %v2135_v57 = vpop.xlane.xlu0 %2134 }
 0x2ed   : > { %2157 = vxpose.xlu0.b32.cont [13/16] (narrow) %v2135_v57, 8 }
 0x2f0   : > { %v2138_v58 = vpop.xlane.xlu1 %2137 }
 0x2f1   : > { %2158 = vxpose.xlu0.b32.cont [14/16] (narrow) %v2138_v58, 8 }
 0x2f4   : > { %v2141_v31 = vpop.xlane.xlu0 %2140 }
 0x2f5   : > { %2159 = vxpose.xlu0.b32.cont [15/16] (narrow) %v2141_v31, 8 }
 0x2f8   : > { %v2144_v9 = vpop.xlane.xlu1 %2143 }
 0x2f9   : > { %2160 = vxpose.xlu0.b32.end [16/16] (narrow) %v2144_v9, 8 }
 0x339   : > { %v2161_v53 = vpop.trf.xlu0 }
 0x33a   : > { %v2179_v61 = vadd.f32 %v2178_v10, %v2161_v53 }
 0x33c   : > { %v2399_v59 = vmul.f32 -1.442695, %v2179_v61 }
 0x33e   : > { %2671 = vpow2.f32 %v2399_v59 }
 0x34b   : > { %v2672_v44 = vpop.eup %2671 }
 0x34c   : > { %v2183_v56 = vadd.f32 1.0, %v2672_v44 }
 0x34e   : > { %2673 = vrcp.f32 %v2183_v56 }
 0x35b   : > { %v2674_v2 = vpop.eup %2673 }
 0x35c   : > { %2186 = vst [vmem:[%s274_s17] sm:$0x1] %v2674_v2 }
 0x35d   : > { %2688 = shalt.err (!%p2685_p3)
}
 0x35e   : > { %s2689_s9 = scalar_lea.hbm %s3621_s16, 16  ;;  %s2693_s24 = scalar_lea.hbm %s3663_s7, 48 }
 0x35f   : > { %p2690_p4 = scmp.ne.s32.totalorder %s3621_s16, %s2689_s9  ;;  %p2694_p9 = scmp.lt.s32.totalorder %s3621_s16, %s3663_s7 }
 0x360   : > { %p2695_p10 = scmp.lt.s32.totalorder %s2693_s24, %s2689_s9 }
 0x361   : > { %p2691_p7 = pnand %p2690_p4, %p2819_p5 }
 0x362   : > { %p2696_p11 = por %p2695_p10, %p2694_p9 }
 0x363   : > { %p2692_p8 = pneg %p2691_p7 }
 0x365   : > { %p2697_p12 = pnand %p2696_p11, %p2692_p8 }
 0x367   : > { %2700 = shalt.err (!%p2697_p12)
}
 0x368   : > { %2436 = dma.vmem_to_hbm [thread:$0]  (%p2819_p5), %s2201_s30, 16, %s3621_s16, %s2188_s18  }
 0x369 PF: > { %p2442_p13 = scmp.ge.s32.totalorder %s2735_s29, 2  ;;  %s2212_s17 = sand.u32 1, %s2723_s26  }
 0x36a   : > { %s2213_s14 = scalar_lea.sflag [#allocation4], %s2212_s17 }
 0x36b   : > { %p2439_p0 = pnand %p2442_p13, %p2823_p6 }
 0x36d   : > { %p2440_p1 = pneg %p2439_p0 }
 0x36f   : > { %2718 = dma.done.wait (%p2440_p1), %s2213_s14, 16  }
 0x370   : > { %2720 = vsyncadd (%p2440_p1), %s2213_s14, 4294967280  ;;  %p18_p2 = scmp.ge.s32.totalorder %s2805_s8, 5   ;;  %s3666_s26 = smov %s2727_s27 }
 0x371   : > { %s3667_s27 = smov %s2731_s28  ;;  %s3668_s28 = smov %s2817_s11 }
 0x372   : > { %s3669_s29 = smov %s2805_s8  ;;  %20 = sbr.rel (!%p18_p2) target bundleno = 5 (0x5), region = 83 }
 0x377   :  { %2217 = vsyncpa [#allocation4], 1 }
 0x378   :  { %2219 = vsyncpa [#allocation4 + $0x1], 1 }

</bundles_post_ra>
